<compile_context>
chip_gen: v7x
topology: tpu7x:2x2x1
jax: 0.10.0
libtpu: 0.0.40
codegen_flags: <defaults>
</compile_context>

<pallas_src>
import functools

import jax
import jax.numpy as jnp
from jax import lax
from jax.experimental import pallas as pl
from jax.experimental.pallas import tpu as pltpu


# ---------------------------------------------------------------------------
# One Conv1d (+LeakyReLU) (+sum-pool) layer on a (TB, Lcur, Cin) batch block.
#   h : (TB, Lcur, Cin) f32 activation.
#   w : (K*Cin, Cout)  f32 im2col-packed weight (tap-major rows); Cout may be
#       lane-padded with zero columns for the final layer.
# ---------------------------------------------------------------------------
def _conv_block(h, w, *, K, pad, lrelu, pool):
    tb, lcur, cin = h.shape
    cout = w.shape[1]

    # Zero padding in registers (no VMEM scratch round trip).
    if pad:
        z = jnp.zeros((tb, pad, cin), h.dtype)
        xp = jnp.concatenate([z, h, z], axis=1)              # (TB, Lp, Cin)
    else:
        xp = h
    lp = lcur + 2 * pad
    lout = lp - (K - 1)

    # im2col wide input: tap k occupies columns [k*Cin, (k+1)*Cin).
    xpk = jnp.concatenate([xp[:, k:k + lout, :] for k in range(K)], axis=2)

    # Single MXU matmul for the whole batch block (M = TB*Lout).
    y = jnp.dot(xpk.reshape(tb * lout, K * cin), w,
                preferred_element_type=jnp.float32)          # (TB*Lout, Cout)

    if lrelu:
        y = jnp.where(y >= 0, y, 0.2 * y)

    if pool:
        # Sum-pool pairs along L; the 0.5 of AvgPool1d(2) is pre-folded into
        # the NEXT layer's packed weights.  Row pairs never straddle a batch
        # element because every per-element Lout here is even.
        y = y.reshape(tb, lout // 2, 2, cout).sum(axis=2)    # (TB, Lout/2, Cout)
    else:
        y = y.reshape(tb, lout, cout)
    return y


def _encoder_kernel(x_ref, w1_ref, w2_ref, w3_ref, w4_ref, w5_ref, o_ref):
    h = x_ref[...]                                           # (TB, L, 2) f32
    h = _conv_block(h, w1_ref[...], K=3, pad=1, lrelu=True,  pool=True)
    h = _conv_block(h, w2_ref[...], K=3, pad=1, lrelu=True,  pool=True)
    h = _conv_block(h, w3_ref[...], K=3, pad=1, lrelu=True,  pool=True)
    h = _conv_block(h, w4_ref[...], K=3, pad=1, lrelu=True,  pool=True)
    h = _conv_block(h, w5_ref[...], K=2, pad=0, lrelu=False, pool=False)
    o_ref[...] = h.astype(o_ref.dtype)                       # (TB, Lf, Cpad)


# ---------------------------------------------------------------------------
# Public wrapper: accepts / returns the PyTorch NCW layout.
# ---------------------------------------------------------------------------
def encoder_forward_pallas(x_ncw, params, *, block_b=8):
    B, cin, L = x_ncw.shape
    assert cin == 2, "Encoder expects 2 input channels"
    assert L % 16 == 0 and L >= 32, "L must be a multiple of 16 and >= 32"

    w1, w2, w3, w4, w5 = (params[f"w{i}"] for i in range(1, 6))
    ndf = w1.shape[1]
    cout5 = 4 * ndf                    # true output channels
    cpad = w5.shape[1]                 # lane-padded output channels (x128)
    Lf = L // 16 - 1                   # 4 pools then a K=2 'valid' conv

    x = jnp.transpose(x_ncw, (0, 2, 1))                      # (B, L, 2)

    # Batch blocking: TB elements per grid step.
    # NOTE(v7x): pick block_b so that the number of grid steps is >= 2 (ideally
    # even) so dimension_semantics=('parallel',) can split it across both TCs.
    tb = min(block_b, B)
    nb = pl.cdiv(B, tb)
    Bp = nb * tb
    if Bp != B:
        x = jnp.concatenate([x, jnp.zeros((Bp - B, L, cin), x.dtype)], axis=0)

    # Advisory cost estimate so XLA schedules this tiny custom call sensibly.
    flops = 0
    lcur = L
    for (kk, ci, co) in [(3, 2, ndf), (3, ndf, ndf),
                         (3, ndf, 2 * ndf), (3, 2 * ndf, 2 * ndf)]:
        flops += 2 * lcur * (kk * ci) * co
        lcur //= 2
    flops += 2 * (lcur - 1) * (2 * 2 * ndf) * cout5
    flops *= Bp
    bytes_accessed = (int(x.size) + Bp * Lf * cpad
                      + sum(int(params[f"w{i}"].size) for i in range(1, 6))) * 4

    out = pl.pallas_call(
        _encoder_kernel,
        out_shape=jax.ShapeDtypeStruct((Bp, Lf, cpad), jnp.float32),
        grid=(nb,),
        in_specs=[
            pl.BlockSpec((tb, L, cin), lambda b: (b, 0, 0)),
            # Constant block index -> each weight is DMA'd to VMEM once and
            # stays resident across all grid steps.
            pl.BlockSpec(w1.shape, lambda b: (0, 0)),
            pl.BlockSpec(w2.shape, lambda b: (0, 0)),
            pl.BlockSpec(w3.shape, lambda b: (0, 0)),
            pl.BlockSpec(w4.shape, lambda b: (0, 0)),
            pl.BlockSpec(w5.shape, lambda b: (0, 0)),
        ],
        out_specs=pl.BlockSpec((tb, Lf, cpad), lambda b: (b, 0, 0)),
        compiler_params=pltpu.CompilerParams(
            dimension_semantics=("parallel",)),
        cost_estimate=pl.CostEstimate(
            flops=flops, transcendentals=0, bytes_accessed=bytes_accessed),
    )(x, w1, w2, w3, w4, w5)

    out = out[:B, :, :cout5]                                 # drop lane padding
    return jnp.transpose(out, (0, 2, 1))                     # (B, 4*ndf, Lf)


# ---------------------------------------------------------------------------
# Pure-JAX reference (NCW, same as PyTorch) for the correctness check.
# ---------------------------------------------------------------------------
def _conv_ref(x, w_oiw, pad):
    return lax.conv_general_dilated(
        x, w_oiw, window_strides=(1,), padding=[(pad, pad)],
        dimension_numbers=("NCH", "OIH", "NCH"))


def _lrelu(x):
    return jnp.where(x >= 0, x, 0.2 * x)


def _avgpool2(x):
    B, C, L = x.shape
    return x.reshape(B, C, L // 2, 2).mean(-1)


def encoder_forward_ref(x, torch_weights):
    w1, w2, w3, w4, w5 = torch_weights
    x = _avgpool2(_lrelu(_conv_ref(x, w1, 1)))
    x = _avgpool2(_lrelu(_conv_ref(x, w2, 1)))
    x = _avgpool2(_lrelu(_conv_ref(x, w3, 1)))
    x = _avgpool2(_lrelu(_conv_ref(x, w4, 1)))
    x = _conv_ref(x, w5, 0)
    return x


# ---------------------------------------------------------------------------
# Deterministic parameter init.  PyTorch weight shape: (Cout, Cin, K).
# Kernel (im2col) layout: W[k*Cin + ci, co] = w[co, ci, k]; layers 2..5 carry
# an extra 0.5 factor (folds the AvgPool1d(2) mean of the previous layer);
# the last layer's Cout is zero-padded to a multiple of 128 lanes.
# ---------------------------------------------------------------------------
def _pack_im2col(w_oik, scale, pad_cout_to=None):
    cout, cin, K = w_oik.shape
    wp = jnp.transpose(w_oik, (2, 1, 0)).reshape(K * cin, cout) * scale
    if pad_cout_to is not None and pad_cout_to > cout:
        wp = jnp.pad(wp, ((0, 0), (0, pad_cout_to - cout)))
    return wp


def init_params(key, ndf):
    shapes = [
        (ndf, 2, 3),            # conv1
        (ndf, ndf, 3),          # conv2
        (ndf * 2, ndf, 3),      # conv3
        (ndf * 2, ndf * 2, 3),  # conv4
        (ndf * 4, ndf * 2, 2),  # conv5
    ]
    keys = jax.random.split(key, len(shapes))
    torch_weights = [jax.random.normal(k, s, jnp.float32) * 0.1
                     for k, s in zip(keys, shapes)]
    cout5 = 4 * ndf
    cpad = ((cout5 + 127) // 128) * 128
    scales = [1.0, 0.5, 0.5, 0.5, 0.5]
    pads = [None, None, None, None, cpad]
    params = {f"w{i + 1}": _pack_im2col(w, s, p)
              for i, (w, s, p) in enumerate(zip(torch_weights, scales, pads))}
    return params, torch_weights


if __name__ == "__main__":
    B, L, ndf = 2, 32, 16
    key = jax.random.PRNGKey(0)
    kx, kw = jax.random.split(key)
    x = jax.random.normal(kx, (B, 2, L), jnp.float32)        # PyTorch NCW input
    params, torch_weights = init_params(kw, ndf)

    fwd = jax.jit(functools.partial(encoder_forward_pallas, params=params))
    out = jax.block_until_ready(fwd(x))

    ref = encoder_forward_ref(x, torch_weights)

    assert out.shape == (B, 4 * ndf, 1), out.shape
    max_err = float(jnp.max(jnp.abs(out - ref)))
    if max_err > 1e-4:
        raise AssertionError(f"mismatch vs reference, max abs err = {max_err}")

    print("KERNEL_OK")
</pallas_src>

<mosaic_0001>
module attributes {stable_mosaic.version = 11 : i64} {
  func.func @_encoder_kernel(%arg0: i32, %arg1: memref<2x32x2xf32, #tpu.memory_space<vmem>>, %arg2: memref<6x16xf32, #tpu.memory_space<vmem>>, %arg3: memref<48x16xf32, #tpu.memory_space<vmem>>, %arg4: memref<48x32xf32, #tpu.memory_space<vmem>>, %arg5: memref<96x32xf32, #tpu.memory_space<vmem>>, %arg6: memref<64x128xf32, #tpu.memory_space<vmem>>, %arg7: memref<2x1x128xf32, #tpu.memory_space<vmem>>) attributes {dimension_semantics = [#tpu.dimension_semantics<parallel>], iteration_bounds = array<i64: 1>, scalar_prefetch = 0 : i64, scratch_operands = 0 : i64, tpu.core_type = #tpu.core_type<tc>, window_params = [{transform_indices = @transform_0, window_bounds = array<i64: 2, 32, 2>}, {pipeline_mode = #tpu.pipeline_mode<synchronous>, transform_indices = @transform_1, window_bounds = array<i64: 6, 16>}, {pipeline_mode = #tpu.pipeline_mode<synchronous>, transform_indices = @transform_2, window_bounds = array<i64: 48, 16>}, {pipeline_mode = #tpu.pipeline_mode<synchronous>, transform_indices = @transform_3, window_bounds = array<i64: 48, 32>}, {pipeline_mode = #tpu.pipeline_mode<synchronous>, transform_indices = @transform_4, window_bounds = array<i64: 96, 32>}, {pipeline_mode = #tpu.pipeline_mode<synchronous>, transform_indices = @transform_5, window_bounds = array<i64: 64, 128>}, {transform_indices = @transform_6, window_bounds = array<i64: 2, 1, 128>}]} {
    %c0 = arith.constant 0 : index
    %c0_0 = arith.constant 0 : index
    %c0_1 = arith.constant 0 : index
    %0 = vector.load %arg1[%c0, %c0_0, %c0_1] : memref<2x32x2xf32, #tpu.memory_space<vmem>>, vector<2x32x2xf32>
    %c0_2 = arith.constant 0 : index
    %c0_3 = arith.constant 0 : index
    %1 = vector.load %arg2[%c0_2, %c0_3] : memref<6x16xf32, #tpu.memory_space<vmem>>, vector<6x16xf32>
    %cst = arith.constant 0.000000e+00 : f32
    %2 = vector.broadcast %cst : f32 to vector<2x1x2xf32>
    %3 = tpu.concatenate %2, %0, %2 in 1 : vector<2x1x2xf32>, vector<2x32x2xf32>, vector<2x1x2xf32> -> vector<2x34x2xf32>
    %4 = vector.extract_strided_slice %3 {offsets = [0, 0, 0], sizes = [2, 32, 2], strides = [1, 1, 1]} : vector<2x34x2xf32> to vector<2x32x2xf32>
    %5 = vector.extract_strided_slice %3 {offsets = [0, 1, 0], sizes = [2, 32, 2], strides = [1, 1, 1]} : vector<2x34x2xf32> to vector<2x32x2xf32>
    %6 = vector.extract_strided_slice %3 {offsets = [0, 2, 0], sizes = [2, 32, 2], strides = [1, 1, 1]} : vector<2x34x2xf32> to vector<2x32x2xf32>
    %7 = tpu.concatenate %4, %5, %6 in 2 : vector<2x32x2xf32>, vector<2x32x2xf32>, vector<2x32x2xf32> -> vector<2x32x6xf32>
    %8 = vector.shape_cast %7 : vector<2x32x6xf32> to vector<64x6xf32>
    %cst_4 = arith.constant dense<0.000000e+00> : vector<64x16xf32>
    %9 = tpu.matmul %8, %1, %cst_4 {dimension_numbers = #tpu.dot_dimension_numbers<[1], [0], [0], [1], [0, 0, 1, 1], [], []>} : vector<64x6xf32>, vector<6x16xf32>, vector<64x16xf32> -> vector<64x16xf32>
    %cst_5 = arith.constant 0.000000e+00 : f32
    %10 = vector.broadcast %cst_5 : f32 to vector<64x16xf32>
    %11 = arith.cmpf oge, %9, %10 : vector<64x16xf32>
    %cst_6 = arith.constant 2.000000e-01 : f32
    %12 = vector.broadcast %cst_6 : f32 to vector<64x16xf32>
    %13 = arith.mulf %12, %9 : vector<64x16xf32>
    %14 = arith.select %11, %9, %13 : vector<64x16xi1>, vector<64x16xf32>
    %15 = vector.shape_cast %14 : vector<64x16xf32> to vector<2x16x2x16xf32>
    %cst_7 = arith.constant dense<0.000000e+00> : vector<2x16x16xf32>
    %16 = vector.multi_reduction <add>, %15, %cst_7 [2] : vector<2x16x2x16xf32> to vector<2x16x16xf32>
    %c0_8 = arith.constant 0 : index
    %c0_9 = arith.constant 0 : index
    %17 = vector.load %arg3[%c0_8, %c0_9] : memref<48x16xf32, #tpu.memory_space<vmem>>, vector<48x16xf32>
    %cst_10 = arith.constant 0.000000e+00 : f32
    %18 = vector.broadcast %cst_10 : f32 to vector<2x1x16xf32>
    %19 = tpu.concatenate %18, %16, %18 in 1 : vector<2x1x16xf32>, vector<2x16x16xf32>, vector<2x1x16xf32> -> vector<2x18x16xf32>
    %20 = vector.extract_strided_slice %19 {offsets = [0, 0, 0], sizes = [2, 16, 16], strides = [1, 1, 1]} : vector<2x18x16xf32> to vector<2x16x16xf32>
    %21 = vector.extract_strided_slice %19 {offsets = [0, 1, 0], sizes = [2, 16, 16], strides = [1, 1, 1]} : vector<2x18x16xf32> to vector<2x16x16xf32>
    %22 = vector.extract_strided_slice %19 {offsets = [0, 2, 0], sizes = [2, 16, 16], strides = [1, 1, 1]} : vector<2x18x16xf32> to vector<2x16x16xf32>
    %23 = tpu.concatenate %20, %21, %22 in 2 : vector<2x16x16xf32>, vector<2x16x16xf32>, vector<2x16x16xf32> -> vector<2x16x48xf32>
    %24 = vector.shape_cast %23 : vector<2x16x48xf32> to vector<32x48xf32>
    %cst_11 = arith.constant dense<0.000000e+00> : vector<32x16xf32>
    %25 = tpu.matmul %24, %17, %cst_11 {dimension_numbers = #tpu.dot_dimension_numbers<[1], [0], [0], [1], [0, 0, 1, 1], [], []>} : vector<32x48xf32>, vector<48x16xf32>, vector<32x16xf32> -> vector<32x16xf32>
    %cst_12 = arith.constant 0.000000e+00 : f32
    %26 = vector.broadcast %cst_12 : f32 to vector<32x16xf32>
    %27 = arith.cmpf oge, %25, %26 : vector<32x16xf32>
    %cst_13 = arith.constant 2.000000e-01 : f32
    %28 = vector.broadcast %cst_13 : f32 to vector<32x16xf32>
    %29 = arith.mulf %28, %25 : vector<32x16xf32>
    %30 = arith.select %27, %25, %29 : vector<32x16xi1>, vector<32x16xf32>
    %31 = vector.shape_cast %30 : vector<32x16xf32> to vector<2x8x2x16xf32>
    %cst_14 = arith.constant dense<0.000000e+00> : vector<2x8x16xf32>
    %32 = vector.multi_reduction <add>, %31, %cst_14 [2] : vector<2x8x2x16xf32> to vector<2x8x16xf32>
    %c0_15 = arith.constant 0 : index
    %c0_16 = arith.constant 0 : index
    %33 = vector.load %arg4[%c0_15, %c0_16] : memref<48x32xf32, #tpu.memory_space<vmem>>, vector<48x32xf32>
    %cst_17 = arith.constant 0.000000e+00 : f32
    %34 = vector.broadcast %cst_17 : f32 to vector<2x1x16xf32>
    %35 = tpu.concatenate %34, %32, %34 in 1 : vector<2x1x16xf32>, vector<2x8x16xf32>, vector<2x1x16xf32> -> vector<2x10x16xf32>
    %36 = vector.extract_strided_slice %35 {offsets = [0, 0, 0], sizes = [2, 8, 16], strides = [1, 1, 1]} : vector<2x10x16xf32> to vector<2x8x16xf32>
    %37 = vector.extract_strided_slice %35 {offsets = [0, 1, 0], sizes = [2, 8, 16], strides = [1, 1, 1]} : vector<2x10x16xf32> to vector<2x8x16xf32>
    %38 = vector.extract_strided_slice %35 {offsets = [0, 2, 0], sizes = [2, 8, 16], strides = [1, 1, 1]} : vector<2x10x16xf32> to vector<2x8x16xf32>
    %39 = tpu.concatenate %36, %37, %38 in 2 : vector<2x8x16xf32>, vector<2x8x16xf32>, vector<2x8x16xf32> -> vector<2x8x48xf32>
    %40 = vector.shape_cast %39 : vector<2x8x48xf32> to vector<16x48xf32>
    %cst_18 = arith.constant dense<0.000000e+00> : vector<16x32xf32>
    %41 = tpu.matmul %40, %33, %cst_18 {dimension_numbers = #tpu.dot_dimension_numbers<[1], [0], [0], [1], [0, 0, 1, 1], [], []>} : vector<16x48xf32>, vector<48x32xf32>, vector<16x32xf32> -> vector<16x32xf32>
    %cst_19 = arith.constant 0.000000e+00 : f32
    %42 = vector.broadcast %cst_19 : f32 to vector<16x32xf32>
    %43 = arith.cmpf oge, %41, %42 : vector<16x32xf32>
    %cst_20 = arith.constant 2.000000e-01 : f32
    %44 = vector.broadcast %cst_20 : f32 to vector<16x32xf32>
    %45 = arith.mulf %44, %41 : vector<16x32xf32>
    %46 = arith.select %43, %41, %45 : vector<16x32xi1>, vector<16x32xf32>
    %47 = vector.shape_cast %46 : vector<16x32xf32> to vector<2x4x2x32xf32>
    %cst_21 = arith.constant dense<0.000000e+00> : vector<2x4x32xf32>
    %48 = vector.multi_reduction <add>, %47, %cst_21 [2] : vector<2x4x2x32xf32> to vector<2x4x32xf32>
    %c0_22 = arith.constant 0 : index
    %c0_23 = arith.constant 0 : index
    %49 = vector.load %arg5[%c0_22, %c0_23] : memref<96x32xf32, #tpu.memory_space<vmem>>, vector<96x32xf32>
    %cst_24 = arith.constant 0.000000e+00 : f32
    %50 = vector.broadcast %cst_24 : f32 to vector<2x1x32xf32>
    %51 = tpu.concatenate %50, %48, %50 in 1 : vector<2x1x32xf32>, vector<2x4x32xf32>, vector<2x1x32xf32> -> vector<2x6x32xf32>
    %52 = vector.extract_strided_slice %51 {offsets = [0, 0, 0], sizes = [2, 4, 32], strides = [1, 1, 1]} : vector<2x6x32xf32> to vector<2x4x32xf32>
    %53 = vector.extract_strided_slice %51 {offsets = [0, 1, 0], sizes = [2, 4, 32], strides = [1, 1, 1]} : vector<2x6x32xf32> to vector<2x4x32xf32>
    %54 = vector.extract_strided_slice %51 {offsets = [0, 2, 0], sizes = [2, 4, 32], strides = [1, 1, 1]} : vector<2x6x32xf32> to vector<2x4x32xf32>
    %55 = tpu.concatenate %52, %53, %54 in 2 : vector<2x4x32xf32>, vector<2x4x32xf32>, vector<2x4x32xf32> -> vector<2x4x96xf32>
    %56 = vector.shape_cast %55 : vector<2x4x96xf32> to vector<8x96xf32>
    %cst_25 = arith.constant dense<0.000000e+00> : vector<8x32xf32>
    %57 = tpu.matmul %56, %49, %cst_25 {dimension_numbers = #tpu.dot_dimension_numbers<[1], [0], [0], [1], [0, 0, 1, 1], [], []>} : vector<8x96xf32>, vector<96x32xf32>, vector<8x32xf32> -> vector<8x32xf32>
    %cst_26 = arith.constant 0.000000e+00 : f32
    %58 = vector.broadcast %cst_26 : f32 to vector<8x32xf32>
    %59 = arith.cmpf oge, %57, %58 : vector<8x32xf32>
    %cst_27 = arith.constant 2.000000e-01 : f32
    %60 = vector.broadcast %cst_27 : f32 to vector<8x32xf32>
    %61 = arith.mulf %60, %57 : vector<8x32xf32>
    %62 = arith.select %59, %57, %61 : vector<8x32xi1>, vector<8x32xf32>
    %63 = vector.shape_cast %62 : vector<8x32xf32> to vector<2x2x2x32xf32>
    %cst_28 = arith.constant dense<0.000000e+00> : vector<2x2x32xf32>
    %64 = vector.multi_reduction <add>, %63, %cst_28 [2] : vector<2x2x2x32xf32> to vector<2x2x32xf32>
    %c0_29 = arith.constant 0 : index
    %c0_30 = arith.constant 0 : index
    %65 = vector.load %arg6[%c0_29, %c0_30] : memref<64x128xf32, #tpu.memory_space<vmem>>, vector<64x128xf32>
    %66 = vector.extract_strided_slice %64 {offsets = [0, 0, 0], sizes = [2, 1, 32], strides = [1, 1, 1]} : vector<2x2x32xf32> to vector<2x1x32xf32>
    %67 = vector.extract_strided_slice %64 {offsets = [0, 1, 0], sizes = [2, 1, 32], strides = [1, 1, 1]} : vector<2x2x32xf32> to vector<2x1x32xf32>
    %68 = tpu.concatenate %66, %67 in 2 : vector<2x1x32xf32>, vector<2x1x32xf32> -> vector<2x1x64xf32>
    %69 = vector.shape_cast %68 : vector<2x1x64xf32> to vector<2x64xf32>
    %cst_31 = arith.constant dense<0.000000e+00> : vector<2x128xf32>
    %70 = tpu.matmul %69, %65, %cst_31 {dimension_numbers = #tpu.dot_dimension_numbers<[1], [0], [0], [1], [0, 0, 1, 1], [], []>} : vector<2x64xf32>, vector<64x128xf32>, vector<2x128xf32> -> vector<2x128xf32>
    %71 = vector.shape_cast %70 : vector<2x128xf32> to vector<2x1x128xf32>
    %c0_32 = arith.constant 0 : index
    %c0_33 = arith.constant 0 : index
    %c0_34 = arith.constant 0 : index
    %72 = vector.load %arg7[%c0_32, %c0_33, %c0_34] : memref<2x1x128xf32, #tpu.memory_space<vmem>>, vector<2x1x128xf32>
    tpu.vector_store %arg7[%c0_32, %c0_33, %c0_34], %71 {strides = array<i32>} : memref<2x1x128xf32, #tpu.memory_space<vmem>>, vector<2x1x128xf32>,
    return
  }
  func.func @transform_0(%arg0: i32) -> (i32, i32, i32) {
    %c0_i32 = arith.constant 0 : i32
    %c0_i32_0 = arith.constant 0 : i32
    %c0_i32_1 = arith.constant 0 : i32
    return %arg0, %c0_i32, %c0_i32_0 : i32, i32, i32
  }
  func.func @transform_1(%arg0: i32) -> (i32, i32) {
    %c0_i32 = arith.constant 0 : i32
    %c0_i32_0 = arith.constant 0 : i32
    %c0_i32_1 = arith.constant 0 : i32
    return %c0_i32, %c0_i32_0 : i32, i32
  }
  func.func @transform_2(%arg0: i32) -> (i32, i32) {
    %c0_i32 = arith.constant 0 : i32
    %c0_i32_0 = arith.constant 0 : i32
    %c0_i32_1 = arith.constant 0 : i32
    return %c0_i32, %c0_i32_0 : i32, i32
  }
  func.func @transform_3(%arg0: i32) -> (i32, i32) {
    %c0_i32 = arith.constant 0 : i32
    %c0_i32_0 = arith.constant 0 : i32
    %c0_i32_1 = arith.constant 0 : i32
    return %c0_i32, %c0_i32_0 : i32, i32
  }
  func.func @transform_4(%arg0: i32) -> (i32, i32) {
    %c0_i32 = arith.constant 0 : i32
    %c0_i32_0 = arith.constant 0 : i32
    %c0_i32_1 = arith.constant 0 : i32
    return %c0_i32, %c0_i32_0 : i32, i32
  }
  func.func @transform_5(%arg0: i32) -> (i32, i32) {
    %c0_i32 = arith.constant 0 : i32
    %c0_i32_0 = arith.constant 0 : i32
    %c0_i32_1 = arith.constant 0 : i32
    return %c0_i32, %c0_i32_0 : i32, i32
  }
  func.func @transform_6(%arg0: i32) -> (i32, i32, i32) {
    %c0_i32 = arith.constant 0 : i32
    %c0_i32_0 = arith.constant 0 : i32
    %c0_i32_1 = arith.constant 0 : i32
    return %arg0, %c0_i32, %c0_i32_0 : i32, i32, i32
  }
}

</mosaic_0001>

<bundles_post_ra>
// kernel: encoder_forward_pallas.1
= control target key start
LH: loop header
LB: loop body
LE: loop exit
PB: predicated region body
PF: predicated region fallthrough
CT: control target
= control target key end

     0   :  { %11 = vsyncpa [#allocation3], 0  ;;  %s2689_s0 = inlined_call_operand.vmem [shape: f32[2,32,2], index: 0, kind: input, shape index: {}]   ;;  %s2690_s1 = inlined_call_operand.vmem [shape: f32[6,16], index: 1, kind: input, shape index: {}]   ;;  %s2691_s2 = inlined_call_operand.hbm [shape: f32[48,16], index: 2, kind: input, shape index: {}]   ;;  %s2692_s3 = inlined_call_operand.hbm [shape: f32[48,32], index: 3, kind: input, shape index: {}]   ;;  %s2693_s4 = inlined_call_operand.hbm [shape: f32[96,32], index: 4, kind: input, shape index: {}]   ;;  %s2694_s5 = inlined_call_operand.vmem [shape: f32[64,128], index: 5, kind: input, shape index: {}]   ;;  %s2695_s6 = inlined_call_operand.vmem [shape: f32[2,1,128], index: 6, kind: output, shape index: {}]  }
   0x1   :  { %12 = vsyncpa [#allocation5], 0  ;;  %s2099_s21 = smov [#allocation4]   ;;  %s2100_s23 = smov [#allocation2]  }
   0x2   :  { %s34_s22 = sshll.u32 %s2099_s21, 4  ;;  %s22_s24 = sshll.u32 %s2100_s23, 4  ;;  %s35_s22 = int_to_ptr.vmem [resolvable:$true] %s34_s22  ;;  %s2149_s24 = int_to_ptr.vmem [resolvable:$true] %s22_s24 }
   0x3   :  { %s2029_s27 = scalar_lea.hbm %s2692_s3, 768 }
   0x4   :  { %p2030_p0 = scmp.ne.s32.totalorder %s2692_s3, %s2029_s27  ;;  %p2033_p1 = scmp.lt.u32.totalorder %s2029_s27, %s2692_s3 }
   0x6   :  { %p2035_p2 = pnand %p2033_p1, %p2030_p0 }
   0x8   :  { %2038 = shalt.err (!%p2035_p2)
}
   0x9   :  { %s2039_s8 = scalar_lea.vmem %s35_s22, 768  ;;  %p2044_p4 = scmp.lt.s32.totalorder %s35_s22, %s35_s22 }
   0xa   :  { %p2040_p3 = scmp.ne.s32.totalorder %s35_s22, %s2039_s8  ;;  %p2045_p5 = scmp.lt.s32.totalorder %s2039_s8, %s2039_s8 }
   0xc   :  { %p2046_p6 = por %p2045_p5, %p2044_p4 }
   0xe   :  { %p2047_p7 = pnand %p2046_p6, %p2040_p3 }
  0x10   :  { %2050 = shalt.err (!%p2047_p7)
}
  0x11   :  { %s2101_s9 = smov 128   ;;  %s2102_s10 = smov 8  }
  0x12   :  { %40 = dma.hbm_to_vmem [thread:$0]  %s2692_s3, 768, %s35_s22, [#allocation5], %s2101_s9, %s2101_s9, %s2102_s10  }
  0x13   :  { %s2051_s15 = scalar_lea.hbm %s2691_s2, 768 }
  0x14   :  { %p2052_p8 = scmp.ne.s32.totalorder %s2691_s2, %s2051_s15  ;;  %p2055_p9 = scmp.lt.u32.totalorder %s2051_s15, %s2691_s2 }
  0x16   :  { %p2057_p10 = pnand %p2055_p9, %p2052_p8 }
  0x18   :  { %2060 = shalt.err (!%p2057_p10)
}
  0x19   :  { %s2061_s20 = scalar_lea.vmem %s2149_s24, 768  ;;  %p2066_p12 = scmp.lt.s32.totalorder %s2149_s24, %s2149_s24 }
  0x1a   :  { %p2062_p11 = scmp.ne.s32.totalorder %s2149_s24, %s2061_s20  ;;  %p2067_p13 = scmp.lt.s32.totalorder %s2061_s20, %s2061_s20 }
  0x1c   :  { %p2068_p0 = por %p2067_p13, %p2066_p12 }
  0x1e   :  { %p2069_p1 = pnand %p2068_p0, %p2062_p11 }
  0x20   :  { %2072 = shalt.err (!%p2069_p1)
}
  0x21   :  { %28 = dma.hbm_to_vmem [thread:$0]  %s2691_s2, 768, %s2149_s24, [#allocation3], %s2101_s9, %s2101_s9, %s2102_s10  }
  0x22   :  { %s2103_s22 = smov [#allocation6]   ;;  %s2073_s27 = scalar_lea.hbm %s2693_s4, 1536 }
  0x23   :  { %s46_s23 = sshll.u32 %s2103_s22, 4  ;;  %p2074_p2 = scmp.ne.s32.totalorder %s2693_s4, %s2073_s27  ;;  %s47_s23 = int_to_ptr.vmem [resolvable:$true] %s46_s23 }
  0x24   :  { %p2077_p3 = scmp.lt.u32.totalorder %s2073_s27, %s2693_s4 }
  0x26   :  { %p2079_p4 = pnand %p2077_p3, %p2074_p2 }
  0x28   :  { %2082 = shalt.err (!%p2079_p4)
}
  0x29   :  { %s2083_s8 = scalar_lea.vmem %s47_s23, 1536  ;;  %p2088_p6 = scmp.lt.s32.totalorder %s47_s23, %s47_s23 }
  0x2a   :  { %p2084_p5 = scmp.ne.s32.totalorder %s47_s23, %s2083_s8  ;;  %p2089_p7 = scmp.lt.s32.totalorder %s2083_s8, %s2083_s8 }
  0x2c   :  { %p2090_p8 = por %p2089_p7, %p2088_p6 }
  0x2e   :  { %p2091_p9 = pnand %p2090_p8, %p2084_p5 }
  0x30   :  { %2094 = shalt.err (!%p2091_p9)
}
  0x31   :  { %52 = dma.hbm_to_vmem [thread:$0]  %s2693_s4, 1536, %s47_s23, [#allocation5], %s2101_s9, %s2101_s9, %s2102_s10  }
  0x32   :  { %2095 = dma.done.wait [#allocation3], 768  }
  0x33   :  { %2096 = vsyncadd [#allocation3], 4294966528 }
  0x34   :  { %2097 = dma.done.wait [#allocation5], 2304  }
  0x35   :  { %2098 = vsyncadd [#allocation5], 4294964992  ;;  %v64_v0 = vld [vmem:[%s2689_s0] sm:$0xff]  ;;  %v65_v1 = vld [vmem:[%s2689_s0 + $0x8] sm:$0xff]  ;;  %vm81_vm0 = vcmask 1040384   ;;  %vm157_vm1 = vcmask 1045504  }
  0x36   :  { %v66_v2 = vld [vmem:[%s2689_s0 + $0x10] sm:$0xff]  ;;  %v82_v3 = vrot.slane %v64_v0, 7  ;;  %v83_v4 = vrot.slane %v65_v1, 7  ;;  %v67_v6 = vld [vmem:[%s2689_s0 + $0x18] sm:$0xff]  ;;  %vm114_vm2 = vcmask 1046528   ;;  %v68_v22 = vld [vmem:[%s2689_s0 + $0x20] sm:$0xff] }
  0x37   :  { %v85_v5 = vrot.slane %v66_v2, 7  ;;  %v87_v7 = vrot.slane %v67_v6, 7  ;;  %v72_v11 = vld [vmem:[%s2690_s1] sm:$0x3f]  ;;  %v69_v23 = vld [vmem:[%s2689_s0 + $0x28] sm:$0xff]  ;;  %v70_v24 = vld [vmem:[%s2689_s0 + $0x30] sm:$0xff] }
  0x38   :  { %v2214_v8 = vsel %vm81_vm0, %v82_v3, %v83_v4  ;;  %v2217_v9 = vsel %vm81_vm0, 0.0, %v82_v3  ;;  %1867 = vmatprep.subr.msk.mxu0 %vm157_vm1, %v72_v11  ;;  %s2104_s22 = smov 4   ;;  %s2105_s23 = smov 2   ;;  %v89_v29 = vrot.slane %v68_v22, 7  ;;  %v90_v30 = vrot.slane %v69_v23, 7  ;;  %v71_v39 = vld [vmem:[%s2689_s0 + $0x38] sm:$0xff] }
  0x39   :  { %v2220_v10 = vsel %vm81_vm0, %v83_v4, %v85_v5  ;;  %v158_v12 = vrot.slane %v2217_v9, 2  ;;  %v159_v13 = vrot.slane %v2214_v8, 2  ;;  %v115_v14 = vrot.slane %v2217_v9, 1  ;;  %1868 = vmatpush3.msk.msra.mxu0 %vm157_vm1, %v72_v11  ;;  %s2107_s0 = smov 16   ;;  %s2108_s27 = smov 32  }
  0x3a   :  { %v116_v15 = vrot.slane %v2214_v8, 1  ;;  %v161_v16 = vrot.slane %v2220_v10, 2  ;;  %v118_v17 = vrot.slane %v2220_v10, 1  ;;  %v2233_v18 = vsel %vm81_vm0, %v85_v5, %v87_v7  ;;  %s2112_s28 = smov 64  }
  0x3b   :  { %v108_v19 = vsel %vm81_vm0, %v87_v7, 0.0  ;;  %v160_v20 = vsel %vm157_vm1, %v158_v12, %v159_v13  ;;  %v120_v27 = vrot.slane %v2233_v18, 1  ;;  %v92_v31 = vrot.slane %v70_v24, 7 }
  0x3c   :  { %v117_v21 = vsel %vm114_vm2, %v115_v14, %v116_v15  ;;  %176 = vrot.lane.b32.xlu1 %v160_v20, %s2104_s22  ;;  %v162_v25 = vsel %vm157_vm1, %v159_v13, %v161_v16  ;;  %v119_v26 = vsel %vm114_vm2, %v116_v15, %v118_v17  ;;  %v122_v28 = vrot.slane %v108_v19, 1 }
  0x3d   :  { %133 = vrot.lane.b32.xlu0 %v117_v21, %s2105_s23  ;;  %v163_v32 = vrot.slane %v2233_v18, 2  ;;  %v165_v33 = vrot.slane %v108_v19, 2  ;;  %v121_v35 = vsel %vm114_vm2, %v118_v17, %v120_v27  ;;  %v2259_v36 = vsel %vm81_vm0, %v89_v29, %v90_v30 }
  0x3e   :  { %v123_v34 = vsel %vm114_vm2, %v120_v27, %v122_v28  ;;  %v2262_v37 = vsel %vm81_vm0, %v90_v30, %v92_v31  ;;  %v2265_v38 = vsel %vm81_vm0, 0.0, %v89_v29  ;;  %v125_v42 = vrot.slane %v2259_v36, 1 }
  0x3f   :  { %v166_v40 = vsel %vm157_vm1, %v163_v32, %v165_v33  ;;  %v164_v41 = vsel %vm157_vm1, %v161_v16, %v163_v32  ;;  %v127_v43 = vrot.slane %v2262_v37, 1  ;;  %v124_v44 = vrot.slane %v2265_v38, 1  ;;  %v777_v32 = vld [vmem:[#allocation2 + $0x8] sm:$0xff]  ;;  %v778_v33 = vld [vmem:[#allocation2 + $0x10] sm:$0xff] }
  0x40   :  { %178 = vrot.lane.b32.xlu1 %v162_v25, %s2104_s22  ;;  %v94_v45 = vrot.slane %v71_v39, 7  ;;  %v168_v46 = vrot.slane %v2259_v36, 2  ;;  %v170_v49 = vrot.slane %v2262_v37, 2  ;;  %v167_v50 = vrot.slane %v2265_v38, 2 }
  0x41   :  { %135 = vrot.lane.b32.xlu0 %v119_v26, %s2105_s23  ;;  %v128_v47 = vsel %vm114_vm2, %v125_v42, %v127_v43  ;;  %v126_v48 = vsel %vm114_vm2, %v124_v44, %v125_v42  ;;  %vm200_vm3 = vcmask 15360   ;;  %vm209_vm4 = vcmask 31744  }
  0x42   :  { %v95_v51 = vsel %vm81_vm0, %v92_v31, %v94_v45  ;;  %v109_v52 = vsel %vm81_vm0, %v94_v45, 0.0  ;;  %v171_v53 = vsel %vm157_vm1, %v168_v46, %v170_v49  ;;  %v169_v54 = vsel %vm157_vm1, %v167_v50, %v168_v46  ;;  %v776_v31 = vld [vmem:[#allocation2] sm:$0xff] }
  0x43   :  { %v129_v55 = vrot.slane %v95_v51, 1  ;;  %v131_v56 = vrot.slane %v109_v52, 1  ;;  %v172_v59 = vrot.slane %v95_v51, 2  ;;  %v174_v60 = vrot.slane %v109_v52, 2 }
  0x44   :  { %139 = vrot.lane.b32.xlu1 %v123_v34, %s2105_s23  ;;  %vm218_vm5 = vcmask 48128   ;;  %v1960_v34 = vpack.c.bf16 %v777_v32, %v776_v31  ;;  %v387_v39 = vlaneseq  ;;  %vm551_vm8 = vcmask 123904  }
  0x45   :  { %137 = vrot.lane.b32.xlu0 %v121_v35, %s2105_s23  ;;  %v132_v57 = vsel %vm114_vm2, %v129_v55, %v131_v56  ;;  %v130_v58 = vsel %vm114_vm2, %v127_v43, %v129_v55  ;;  %v175_v61 = vsel %vm157_vm1, %v172_v59, %v174_v60  ;;  %v173_v62 = vsel %vm157_vm1, %v170_v49, %v172_v59  ;;  %v779_v35 = vld [vmem:[#allocation2 + $0x18] sm:$0xff] }
  0x46   :  { %1961 = vmatprep.subr.bf16.mxu1 %v1960_v34  ;;  %vm814_vm9 = vcmask 1042434   ;;  %vm816_vm13 = vcmask 1043459   ;;  %vm826_vm14 = vcmask 1041409  }
  0x47   :  { %1963 = vmatpush3.bf16.msra.mxu1 %v1960_v34 }
  0x48   :  { %182 = vrot.lane.b32.xlu1 %v166_v40, %s2104_s22 }
  0x49   :  { %180 = vrot.lane.b32.xlu0 %v164_v41, %s2104_s22  ;;  %v2331_v41 = vshrl.u32 %v387_v39, 7 }
  0x4c   :  { %143 = vrot.lane.b32.xlu1 %v128_v47, %s2105_s23 }
  0x4d   :  { %141 = vrot.lane.b32.xlu0 %v126_v48, %s2105_s23 }
  0x50   :  { %186 = vrot.lane.b32.xlu1 %v171_v53, %s2104_s22 }
  0x51   :  { %184 = vrot.lane.b32.xlu0 %v169_v54, %s2104_s22 }
  0x54   :  { %147 = vrot.lane.b32.xlu1 %v132_v57, %s2105_s23 }
  0x55   :  { %145 = vrot.lane.b32.xlu0 %v130_v58, %s2105_s23 }
  0x58   :  { %190 = vrot.lane.b32.xlu1 %v175_v61, %s2104_s22 }
  0x59   :  { %188 = vrot.lane.b32.xlu0 %v173_v62, %s2104_s22 }
  0xae   :  { %v177_v63 = vpop.permute.xlu1 %176 }
  0xaf   :  { %v134_v0 = vpop.permute.xlu0 %133 }
  0xb0   :  { %v201_v1 = vsel %vm200_vm3, %v2217_v9, %v134_v0 }
  0xb1   :  { %v210_v2 = vsel %vm209_vm4, %v201_v1, %v177_v63 }
  0xb2   :  { %1869 = vmatprep.mubr.msk.f32.mxu0 %vm218_vm5, %v210_v2  ;;  %v179_v3 = vpop.permute.xlu1 %178 }
  0xb3   :  { %v136_v4 = vpop.permute.xlu0 %135 }
  0xb4   :  { %v202_v5 = vsel %vm200_vm3, %v2214_v8, %v136_v4 }
  0xb5   :  { %v211_v6 = vsel %vm209_vm4, %v202_v5, %v179_v3 }
  0xb6   :  { %1870 = vmatmul.mubr.msk.f32.vlgmr.msra.gmra.mrb[0].mxu0 %vm218_vm5, %v211_v6  ;;  %v140_v7 = vpop.permute.xlu1 %139 }
  0xb7   :  { %v138_v11 = vpop.permute.xlu0 %137  ;;  %v204_v12 = vsel %vm200_vm3, %v2233_v18, %v140_v7 }
  0xb8   :  { %v203_v9 = vsel %vm200_vm3, %v2220_v10, %v138_v11 }
  0xba   :  { %v183_v13 = vpop.permute.xlu1 %182 }
  0xbb   :  { %v181_v14 = vpop.permute.xlu0 %180  ;;  %v213_v15 = vsel %vm209_vm4, %v204_v12, %v183_v13 }
  0xbc   :  { %v212_v16 = vsel %vm209_vm4, %v203_v9, %v181_v14 }
  0xbd   :  { %1872 = vmatprep.mubr.msk.f32.mxu0 %vm218_vm5, %v212_v16 }
  0xbe   :  { %1873 = vmatmul.mubr.msk.f32.gmra.mrb[2].mxu0 %vm218_vm5, %v213_v15  ;;  %v144_v8 = vpop.permute.xlu1 %143 }
  0xbf   :  { %v142_v17 = vpop.permute.xlu0 %141  ;;  %v206_v19 = vsel %vm200_vm3, %v2259_v36, %v144_v8  ;;  %v1964_v36 = vpack.c.bf16 %v779_v35, %v778_v33 }
  0xc0   :  { %v205_v18 = vsel %vm200_vm3, %v2265_v38, %v142_v17 }
  0xc1   :  { %1965 = vmatprep.subr.bf16.mxu1 %v1964_v36 }
  0xc2   :  { %v187_v20 = vpop.permute.xlu1 %186  ;;  %1967 = vmatpush3.bf16.msra.mxu1 %v1964_v36 }
  0xc3   :  { %v185_v10 = vpop.permute.xlu0 %184  ;;  %v215_v21 = vsel %vm209_vm4, %v206_v19, %v187_v20 }
  0xc4   :  { %v214_v22 = vsel %vm209_vm4, %v205_v18, %v185_v10 }
  0xc5   :  { %1875 = vmatprep.mubr.msk.f32.mxu0 %vm218_vm5, %v214_v22 }
  0xc6   :  { %1876 = vmatmul.mubr.msk.f32.gmra.mrb[4].mxu0 %vm218_vm5, %v215_v21  ;;  %v148_v23 = vpop.permute.xlu1 %147 }
  0xc7   :  { %v146_v24 = vpop.permute.xlu0 %145  ;;  %v208_v25 = vsel %vm200_vm3, %v95_v51, %v148_v23 }
  0xc8   :  { %v207_v26 = vsel %vm200_vm3, %v2262_v37, %v146_v24  ;;  %v2106_v37 = vmov 1983009808  }
  0xc9   :  { %v385_v38 = vunpack.c.l.s4 %v2106_v37 }
  0xca   :  { %v191_v27 = vpop.permute.xlu1 %190 }
  0xcb   :  { %v189_v28 = vpop.permute.xlu0 %188  ;;  %v217_v29 = vsel %vm209_vm4, %v208_v25, %v191_v27  ;;  %v386_v40 = vunpack.c.0.s8 %v385_v38 }
  0xcc   :  { %v216_v30 = vsel %vm209_vm4, %v207_v26, %v189_v28 }
  0xcd   :  { %1878 = vmatprep.mubr.msk.f32.mxu0 %vm218_vm5, %v216_v30  ;;  %v2334_v43 = vsub.s32 %v386_v40, %v2331_v41 }
  0xce   :  { %1879 = vmatmul.mubr.msk.f32.gmra.mrb[6].mxu0 %vm218_vm5, %v217_v29  ;;  %vm818_vm5 = vcmask 1044484  }
 0x189   :  { %v1871_v42 = vpop.f32.mrb[0].mxu0 }
 0x18a   :  { %vm352_vm6 = vcmp.ge.f32.partialorder %v1871_v42, 0.0  ;;  %v360_v44 = vmul.f32 0.2, %v1871_v42  ;;  %v312_v45 = vpop.f32.mrb[1].mxu0 }
 0x18b   :  { %vm351_vm7 = vcmp.ge.f32.partialorder %v312_v45, 0.0  ;;  %v359_v46 = vmul.f32 0.2, %v312_v45 }
 0x18c   :  { %v368_v47 = vsel %vm352_vm6, %v1871_v42, %v360_v44  ;;  %vm820_vm6 = vcmask 1045509  }
 0x18d   :  { %v400_v48 = vcombine.high %v368_v47, %v368_v47  ;;  %v407_v49 = vrot.slane %v368_v47, %v2334_v43  ;;  %v367_v50 = vsel %vm351_vm7, %v312_v45, %v359_v46  ;;  %vm822_vm7 = vcmask 1046534  }
 0x18e   :  { %v383_v51 = vcombine.high %v367_v50, %v367_v50  ;;  %v390_v52 = vrot.slane %v367_v50, %v2334_v43 }
 0x18f   :  { %v414_v53 = vrot.slane %v400_v48, %v2334_v43  ;;  %v415_v54 = vcombine.high %v407_v49, %v407_v49  ;;  %v580_v55 = vsel %vm551_vm8, %v407_v49, 0.0 }
 0x190   :  { %v581_v56 = vrot.slane %v580_v55, 4  ;;  %v397_v57 = vrot.slane %v383_v51, %v2334_v43  ;;  %v398_v58 = vcombine.high %v390_v52, %v390_v52  ;;  %v552_v59 = vsel %vm551_vm8, %v390_v52, 0.0 }
 0x191   :  { %v416_v60 = vcombine.high %v414_v53, %v414_v53  ;;  %v587_v61 = vsel %vm551_vm8, %v415_v54, 0.0  ;;  %v594_v62 = vsel %vm551_vm8, %v414_v53, 0.0  ;;  %v553_v63 = vrot.slane %v552_v59, 4  ;;  %v1874_v0 = vpop.f32.mrb[2].mxu0 }
 0x192   :  { %v582_v1 = vadd.f32 %v581_v56, %v580_v55  ;;  %v588_v2 = vrot.slane %v587_v61, 4  ;;  %v595_v3 = vrot.slane %v594_v62, 4  ;;  %v399_v4 = vcombine.high %v397_v57, %v397_v57  ;;  %v322_v5 = vpop.f32.mrb[3].mxu0 }
 0x193   :  { %v601_v6 = vsel %vm551_vm8, %v416_v60, 0.0  ;;  %v554_v7 = vadd.f32 %v553_v63, %v552_v59  ;;  %v559_v11 = vsel %vm551_vm8, %v398_v58, 0.0  ;;  %v566_v12 = vsel %vm551_vm8, %v397_v57, 0.0 }
 0x194   :  { %v583_v9 = vrot.slane %v582_v1, 2  ;;  %v589_v13 = vadd.f32 %v588_v2, %v587_v61  ;;  %v596_v14 = vadd.f32 %v595_v3, %v594_v62  ;;  %v602_v15 = vrot.slane %v601_v6, 4 }
 0x195   :  { %v555_v16 = vrot.slane %v554_v7, 2  ;;  %v560_v8 = vrot.slane %v559_v11, 4  ;;  %v567_v17 = vrot.slane %v566_v12, 4  ;;  %v573_v19 = vsel %vm551_vm8, %v399_v4, 0.0 }
 0x196   :  { %v584_v18 = vadd.f32 %v583_v9, %v582_v1  ;;  %v590_v20 = vrot.slane %v589_v13, 2  ;;  %v597_v10 = vrot.slane %v596_v14, 2  ;;  %v603_v21 = vadd.f32 %v602_v15, %v601_v6 }
 0x197   :  { %v556_v22 = vadd.f32 %v555_v16, %v554_v7  ;;  %v561_v23 = vadd.f32 %v560_v8, %v559_v11  ;;  %v568_v24 = vadd.f32 %v567_v17, %v566_v12  ;;  %v574_v25 = vrot.slane %v573_v19, 4 }
 0x198   :  { %v591_v26 = vadd.f32 %v590_v20, %v589_v13  ;;  %v598_v27 = vadd.f32 %v597_v10, %v596_v14  ;;  %v604_v28 = vrot.slane %v603_v21, 2  ;;  %v585_v33 = vrot.slane %v584_v18, 1 }
 0x199   :  { %v562_v29 = vrot.slane %v561_v23, 2  ;;  %v569_v30 = vrot.slane %v568_v24, 2  ;;  %v575_v31 = vadd.f32 %v574_v25, %v573_v19  ;;  %v2348_v32 = vpop.f32.mrb[4].mxu0  ;;  %v557_v36 = vrot.slane %v556_v22, 1 }
 0x19a   :  { %v592_v34 = vrot.slane %v591_v26, 1  ;;  %v605_v35 = vadd.f32 %v604_v28, %v603_v21  ;;  %v2350_v37 = vpop.f32.mrb[5].mxu0  ;;  %v599_v38 = vrot.slane %v598_v27, 1  ;;  %vm354_vm10 = vcmp.ge.f32.partialorder %v1874_v0, 0.0 }
 0x19b   :  { %v563_v39 = vadd.f32 %v562_v29, %v561_v23  ;;  %v570_v40 = vadd.f32 %v569_v30, %v568_v24  ;;  %v576_v42 = vrot.slane %v575_v31, 2  ;;  %v362_v48 = vmul.f32 0.2, %v1874_v0 }
 0x19c   :  { %v606_v44 = vrot.slane %v605_v35, 1  ;;  %v2354_v49 = vadd.f32 %v585_v33, %v584_v18  ;;  %v558_v50 = vadd.f32 %v557_v36, %v556_v22  ;;  %vm353_vm11 = vcmp.ge.f32.partialorder %v322_v5, 0.0 }
 0x19d   :  { %v564_v45 = vrot.slane %v563_v39, 1  ;;  %v571_v46 = vrot.slane %v570_v40, 1  ;;  %v2352_v47 = vadd.f32 %v576_v42, %v575_v31  ;;  %v361_v51 = vmul.f32 0.2, %v322_v5 }
 0x19e   :  { %v2356_v52 = vadd.f32 %v592_v34, %v591_v26  ;;  %v2358_v53 = vadd.f32 %v599_v38, %v598_v27  ;;  %v2360_v54 = vadd.f32 %v606_v44, %v605_v35  ;;  %v370_v55 = vsel %vm354_vm10, %v1874_v0, %v362_v48 }
 0x19f   :  { %v565_v56 = vadd.f32 %v564_v45, %v563_v39  ;;  %v434_v57 = vcombine.high %v370_v55, %v370_v55  ;;  %v441_v58 = vrot.slane %v370_v55, %v2334_v43  ;;  %v369_v59 = vsel %vm353_vm11, %v322_v5, %v361_v51 }
 0x1a0   :  { %vm356_vm12 = vcmp.ge.f32.partialorder %v2348_v32, 0.0  ;;  %v572_v60 = vadd.f32 %v571_v46, %v570_v40  ;;  %v578_v61 = vrot.slane %v2352_v47, 1  ;;  %v417_v62 = vcombine.high %v369_v59, %v369_v59 }
 0x1a1   :  { %v424_v63 = vrot.slane %v369_v59, %v2334_v43  ;;  %v2366_v1 = vpop.f32.mrb[6].mxu0  ;;  %v448_v2 = vrot.slane %v434_v57, %v2334_v43  ;;  %v449_v3 = vcombine.high %v441_v58, %v441_v58  ;;  %v636_v0 = vsel %vm551_vm8, %v441_v58, 0.0 }
 0x1a2   :  { %v364_v4 = vmul.f32 0.2, %v2348_v32  ;;  %v2371_v6 = vpop.f32.mrb[7].mxu0  ;;  %v637_v5 = vrot.slane %v636_v0, 4  ;;  %v431_v7 = vrot.slane %v417_v62, %v2334_v43  ;;  %v815_v22 = vsel %vm814_vm9, %v565_v56, %v558_v50 }
 0x1a3   :  { %v432_v11 = vcombine.high %v424_v63, %v424_v63  ;;  %v608_v12 = vsel %vm551_vm8, %v424_v63, 0.0  ;;  %v450_v9 = vcombine.high %v448_v2, %v448_v2  ;;  %v643_v13 = vsel %vm551_vm8, %v449_v3, 0.0 }
 0x1a4   :  { %v650_v14 = vsel %vm551_vm8, %v448_v2, 0.0  ;;  %v609_v15 = vrot.slane %v608_v12, 4  ;;  %v638_v16 = vadd.f32 %v637_v5, %v636_v0  ;;  %v644_v8 = vrot.slane %v643_v13, 4 }
 0x1a5   :  { %v651_v17 = vrot.slane %v650_v14, 4  ;;  %v433_v19 = vcombine.high %v431_v7, %v431_v7  ;;  %v657_v18 = vsel %vm551_vm8, %v450_v9, 0.0  ;;  %v615_v10 = vsel %vm551_vm8, %v432_v11, 0.0 }
 0x1a6   :  { %v610_v20 = vadd.f32 %v609_v15, %v608_v12  ;;  %v622_v21 = vsel %vm551_vm8, %v431_v7, 0.0  ;;  %v639_v23 = vrot.slane %v638_v16, 2  ;;  %v645_v24 = vadd.f32 %v644_v8, %v643_v13 }
 0x1a7   :  { %v652_v25 = vadd.f32 %v651_v17, %v650_v14  ;;  %v616_v27 = vrot.slane %v615_v10, 4  ;;  %v623_v28 = vrot.slane %v622_v21, 4  ;;  %v629_v29 = vsel %vm551_vm8, %v433_v19, 0.0 }
 0x1a8   :  { %v611_v26 = vrot.slane %v610_v20, 2  ;;  %v640_v30 = vadd.f32 %v639_v23, %v638_v16  ;;  %v646_v31 = vrot.slane %v645_v24, 2  ;;  %v658_v34 = vrot.slane %v657_v18, 4 }
 0x1a9   :  { %v653_v33 = vrot.slane %v652_v25, 2  ;;  %v617_v36 = vadd.f32 %v616_v27, %v615_v10  ;;  %v624_v38 = vadd.f32 %v623_v28, %v622_v21  ;;  %v630_v39 = vrot.slane %v629_v29, 4 }
 0x1aa   :  { %v612_v35 = vadd.f32 %v611_v26, %v610_v20  ;;  %v641_v40 = vrot.slane %v640_v30, 1  ;;  %v647_v42 = vadd.f32 %v646_v31, %v645_v24  ;;  %v372_v45 = vsel %vm356_vm12, %v2348_v32, %v364_v4 }
 0x1ab   :  { %v2382_v44 = vadd.f32 %v653_v33, %v652_v25  ;;  %v618_v48 = vrot.slane %v617_v36, 2  ;;  %v625_v50 = vrot.slane %v624_v38, 2  ;;  %v631_v51 = vadd.f32 %v630_v39, %v629_v29 }
 0x1ac   :  { %v613_v46 = vrot.slane %v612_v35, 1  ;;  %v2388_v55 = vadd.f32 %v578_v61, %v2352_v47  ;;  %v2391_v56 = vsel %vm816_vm13, %v572_v60, %v815_v22  ;;  %v2393_v57 = vadd.f32 %v658_v34, %v657_v18 }
 0x1ad   :  { %v468_v58 = vcombine.high %v372_v45, %v372_v45  ;;  %v619_v62 = vadd.f32 %v618_v48, %v617_v36  ;;  %v626_v63 = vadd.f32 %v625_v50, %v624_v38  ;;  %v632_v2 = vrot.slane %v631_v51, 2 }
 0x1ae   :  { %v614_v59 = vadd.f32 %v613_v46, %v612_v35  ;;  %v2395_v3 = vadd.f32 %v641_v40, %v640_v30  ;;  %v648_v32 = vrot.slane %v647_v42, 1  ;;  %v475_v0 = vrot.slane %v372_v45, %v2334_v43 }
 0x1af   :  { %v482_v4 = vrot.slane %v468_v58, %v2334_v43  ;;  %v655_v47 = vrot.slane %v2382_v44, 1  ;;  %v620_v61 = vrot.slane %v619_v62, 1  ;;  %v627_v5 = vrot.slane %v626_v63, 1 }
 0x1b0   :  { %v827_v60 = vsel %vm826_vm14, %v614_v59, %v2360_v54  ;;  %v483_v7 = vcombine.high %v475_v0, %v475_v0  ;;  %v692_v12 = vsel %vm551_vm8, %v475_v0, 0.0  ;;  %v633_v14 = vadd.f32 %v632_v2, %v631_v51 }
 0x1b1   :  { %v484_v11 = vcombine.high %v482_v4, %v482_v4  ;;  %v706_v9 = vsel %vm551_vm8, %v482_v4, 0.0  ;;  %v621_v13 = vadd.f32 %v620_v61, %v619_v62  ;;  %v693_v15 = vrot.slane %v692_v12, 4 }
 0x1b2   :  { %vm355_vm15 = vcmp.ge.f32.partialorder %v2350_v37, 0.0  ;;  %v699_v16 = vsel %vm551_vm8, %v483_v7, 0.0  ;;  %v707_v8 = vrot.slane %v706_v9, 4  ;;  %v363_v19 = vmul.f32 0.2, %v2350_v37 }
 0x1b3   :  { %v713_v17 = vsel %vm551_vm8, %v484_v11, 0.0  ;;  %v2408_v18 = vadd.f32 %v648_v32, %v647_v42  ;;  %v2411_v54 = vsel %vm814_vm9, %v621_v13, %v827_v60  ;;  %v694_v20 = vadd.f32 %v693_v15, %v692_v12 }
 0x1b4   :  { %v700_v10 = vrot.slane %v699_v16, 4  ;;  %v2413_v21 = vadd.f32 %v627_v5, %v626_v63  ;;  %v708_v22 = vadd.f32 %v707_v8, %v706_v9  ;;  %v714_v23 = vrot.slane %v713_v17, 4 }
 0x1b5   :  { %v371_v24 = vsel %vm355_vm15, %v2350_v37, %v363_v19  ;;  %v695_v25 = vrot.slane %v694_v20, 2  ;;  %v634_v29 = vrot.slane %v633_v14, 1  ;;  %v366_v33 = vmul.f32 0.2, %v2366_v1 }
 0x1b6   :  { %v701_v26 = vadd.f32 %v700_v10, %v699_v16  ;;  %v451_v27 = vcombine.high %v371_v24, %v371_v24  ;;  %v458_v28 = vrot.slane %v371_v24, %v2334_v43  ;;  %v709_v30 = vrot.slane %v708_v22, 2 }
 0x1b7   :  { %v715_v31 = vadd.f32 %v714_v23, %v713_v17  ;;  %v696_v34 = vadd.f32 %v695_v25, %v694_v20  ;;  %vm358_vm3 = vcmp.ge.f32.partialorder %v2366_v1, 0.0  ;;  %v2423_v50 = vadd.f32 %v634_v29, %v633_v14 }
 0x1b8   :  { %v702_v35 = vrot.slane %v701_v26, 2  ;;  %v465_v36 = vrot.slane %v451_v27, %v2334_v43  ;;  %v466_v38 = vcombine.high %v458_v28, %v458_v28  ;;  %v2419_v39 = vadd.f32 %v709_v30, %v708_v22 }
 0x1b9   :  { %v716_v40 = vrot.slane %v715_v31, 2  ;;  %v664_v37 = vsel %vm551_vm8, %v458_v28, 0.0  ;;  %v697_v42 = vrot.slane %v696_v34, 1  ;;  %v374_v2 = vsel %vm358_vm3, %v2366_v1, %v366_v33 }
 0x1ba   :  { %v703_v45 = vadd.f32 %v702_v35, %v701_v26  ;;  %v467_v46 = vcombine.high %v465_v36, %v465_v36  ;;  %v665_v48 = vrot.slane %v664_v37, 4  ;;  %v671_v58 = vsel %vm551_vm8, %v466_v38, 0.0 }
 0x1bb   :  { %v717_v51 = vadd.f32 %v716_v40, %v715_v31  ;;  %v678_v59 = vsel %vm551_vm8, %v465_v36, 0.0  ;;  %v672_v63 = vrot.slane %v671_v58, 4  ;;  %vm357_vm4 = vcmp.ge.f32.partialorder %v2371_v6, 0.0 }
 0x1bc   :  { %v666_v62 = vadd.f32 %v665_v48, %v664_v37  ;;  %v2429_v32 = vadd.f32 %v697_v42, %v696_v34  ;;  %v711_v0 = vrot.slane %v2419_v39, 1  ;;  %v679_v4 = vrot.slane %v678_v59, 4 }
 0x1bd   :  { %v685_v61 = vsel %vm551_vm8, %v467_v46, 0.0  ;;  %v704_v5 = vrot.slane %v703_v45, 1  ;;  %v673_v7 = vadd.f32 %v672_v63, %v671_v58  ;;  %v718_v12 = vrot.slane %v717_v51, 1 }
 0x1be   :  { %v667_v60 = vrot.slane %v666_v62, 2  ;;  %v686_v11 = vrot.slane %v685_v61, 4  ;;  %v680_v9 = vadd.f32 %v679_v4, %v678_v59  ;;  %v502_v13 = vcombine.high %v374_v2, %v374_v2 }
 0x1bf   :  { %v509_v14 = vrot.slane %v374_v2, %v2334_v43  ;;  %v674_v1 = vrot.slane %v673_v7, 2  ;;  %v365_v8 = vmul.f32 0.2, %v2371_v6  ;;  %v2443_v2 = vadd.f32 %v704_v5, %v703_v45 }
 0x1c0   :  { %v668_v15 = vadd.f32 %v667_v60, %v666_v62  ;;  %v687_v16 = vadd.f32 %v686_v11, %v685_v61  ;;  %v681_v17 = vrot.slane %v680_v9, 2  ;;  %v516_v19 = vrot.slane %v502_v13, %v2334_v43 }
 0x1c1   :  { %v517_v20 = vcombine.high %v509_v14, %v509_v14  ;;  %v748_v10 = vsel %vm551_vm8, %v509_v14, 0.0  ;;  %v675_v23 = vadd.f32 %v674_v1, %v673_v7  ;;  %v373_v63 = vsel %vm357_vm4, %v2371_v6, %v365_v8 }
 0x1c2   :  { %v669_v22 = vrot.slane %v668_v15, 1  ;;  %v688_v24 = vrot.slane %v687_v16, 2  ;;  %v749_v25 = vrot.slane %v748_v10, 4  ;;  %v682_v26 = vadd.f32 %v681_v17, %v680_v9 }
 0x1c3   :  { %v518_v27 = vcombine.high %v516_v19, %v516_v19  ;;  %v755_v28 = vsel %vm551_vm8, %v517_v20, 0.0  ;;  %v762_v29 = vsel %vm551_vm8, %v516_v19, 0.0  ;;  %v676_v31 = vrot.slane %v675_v23, 1 }
 0x1c4   :  { %v670_v30 = vadd.f32 %v669_v22, %v668_v15  ;;  %v689_v33 = vadd.f32 %v688_v24, %v687_v16  ;;  %v750_v34 = vadd.f32 %v749_v25, %v748_v10  ;;  %v683_v35 = vrot.slane %v682_v26, 1 }
 0x1c5   :  { %v756_v36 = vrot.slane %v755_v28, 4  ;;  %v763_v38 = vrot.slane %v762_v29, 4  ;;  %v769_v40 = vsel %vm551_vm8, %v518_v27, 0.0  ;;  %v677_v37 = vadd.f32 %v676_v31, %v675_v23 }
 0x1c6   :  { %v690_v42 = vrot.slane %v689_v33, 1  ;;  %v751_v46 = vrot.slane %v750_v34, 2  ;;  %v770_v48 = vrot.slane %v769_v40, 4  ;;  %v684_v58 = vadd.f32 %v683_v35, %v682_v26 }
 0x1c7   :  { %v757_v59 = vadd.f32 %v756_v36, %v755_v28  ;;  %v764_v62 = vadd.f32 %v763_v38, %v762_v29  ;;  %v2446_v4 = vadd.f32 %v711_v0, %v2419_v39  ;;  %v834_v61 = vsel %vm814_vm9, %v677_v37, %v670_v30 }
 0x1c8   :  { %v752_v60 = vadd.f32 %v751_v46, %v750_v34  ;;  %v2449_v7 = vadd.f32 %v718_v12, %v717_v51  ;;  %v485_v13 = vcombine.high %v373_v63, %v373_v63  ;;  %v2451_v14 = vadd.f32 %v690_v42, %v689_v33 }
 0x1c9   :  { %v758_v11 = vrot.slane %v757_v59, 2  ;;  %v765_v9 = vrot.slane %v764_v62, 2  ;;  %v771_v15 = vadd.f32 %v770_v48, %v769_v40  ;;  %v492_v6 = vrot.slane %v373_v63, %v2334_v43 }
 0x1ca   :  { %v660_v45 = vrot.slane %v2393_v57, 2  ;;  %v2456_v5 = vsel %vm816_vm13, %v684_v58, %v834_v61  ;;  %v499_v0 = vrot.slane %v485_v13, %v2334_v43  ;;  %vm824_vm10 = vcmask 1047559  }
 0x1cb   :  { %v759_v39 = vadd.f32 %v758_v11, %v757_v59  ;;  %v829_v51 = vsel %vm816_vm13, %v2413_v21, %v2411_v54  ;;  %v753_v12 = vrot.slane %v752_v60, 1  ;;  %v500_v1 = vcombine.high %v492_v6, %v492_v6 }
 0x1cc   :  { %v720_v16 = vsel %vm551_vm8, %v492_v6, 0.0  ;;  %v661_v8 = vadd.f32 %v660_v45, %v2393_v57  ;;  %v2464_v17 = vadd.f32 %v765_v9, %v764_v62  ;;  %v501_v19 = vcombine.high %v499_v0, %v499_v0 }
 0x1cd   :  { %v721_v20 = vrot.slane %v720_v16, 4  ;;  %v656_v10 = vadd.f32 %v655_v47, %v2382_v44  ;;  %v727_v22 = vsel %vm551_vm8, %v500_v1, 0.0  ;;  %v734_v23 = vsel %vm551_vm8, %v499_v0, 0.0  ;;  %v780_v0 = vld [vmem:[#allocation2 + $0x20] sm:$0xff] }
 0x1ce   :  { %v662_v24 = vrot.slane %v661_v8, 1  ;;  %v830_v54 = vsel %vm818_vm5, %v2423_v50, %v829_v51  ;;  %v760_v21 = vrot.slane %v759_v39, 1  ;;  %v728_v26 = vrot.slane %v727_v22, 4  ;;  %v781_v51 = vld [vmem:[#allocation2 + $0x28] sm:$0xff] }
 0x1cf   :  { %v722_v25 = vadd.f32 %v721_v20, %v720_v16  ;;  %v735_v57 = vrot.slane %v734_v23, 4  ;;  %v741_v27 = vsel %vm551_vm8, %v501_v19, 0.0  ;;  %v831_v29 = vsel %vm820_vm6, %v2395_v3, %v830_v54 }
 0x1d0   :  { %v663_v28 = vadd.f32 %v662_v24, %v661_v8  ;;  %v819_v44 = vsel %vm818_vm5, %v2388_v55, %v2391_v56  ;;  %v729_v30 = vadd.f32 %v728_v26, %v727_v22  ;;  %v742_v33 = vrot.slane %v741_v27, 4 }
 0x1d1   :  { %v723_v47 = vrot.slane %v722_v25, 2  ;;  %v736_v31 = vadd.f32 %v735_v57, %v734_v23  ;;  %v754_v34 = vadd.f32 %v753_v12, %v752_v60  ;;  %v832_v50 = vsel %vm822_vm7, %v2408_v18, %v831_v29 }
 0x1d2   :  { %v855_v35 = vsel %vm81_vm0, %v663_v28, 0.0  ;;  %v821_v36 = vsel %vm820_vm6, %v2354_v49, %v819_v44  ;;  %v730_v40 = vrot.slane %v729_v30, 2  ;;  %v743_v37 = vadd.f32 %v742_v33, %v741_v27 }
 0x1d3   :  { %v724_v38 = vadd.f32 %v723_v47, %v722_v25  ;;  %v737_v3 = vrot.slane %v736_v31, 2  ;;  %v761_v42 = vadd.f32 %v760_v21, %v759_v39  ;;  %v767_v55 = vrot.slane %v2464_v17, 1 }
 0x1d4   :  { %v2486_v56 = vsel %vm824_vm10, %v656_v10, %v832_v50  ;;  %v823_v46 = vsel %vm822_vm7, %v2356_v52, %v821_v36  ;;  %v731_v18 = vadd.f32 %v730_v40, %v729_v30  ;;  %v744_v59 = vrot.slane %v743_v37, 2 }
 0x1d5   :  { %v725_v48 = vrot.slane %v724_v38, 1  ;;  %v738_v58 = vadd.f32 %v737_v3, %v736_v31  ;;  %v862_v62 = vrot.slane %v2486_v56, 1  ;;  %v864_v49 = vrot.slane %v855_v35, 1 }
 0x1d6   :  { %v825_v63 = vsel %vm824_vm10, %v2358_v53, %v823_v46  ;;  %v772_v61 = vrot.slane %v771_v15, 2  ;;  %v732_v11 = vrot.slane %v731_v18, 1  ;;  %v745_v13 = vadd.f32 %v744_v59, %v743_v37 }
 0x1d7   :  { %v726_v60 = vadd.f32 %v725_v48, %v724_v38  ;;  %v739_v9 = vrot.slane %v738_v58, 1  ;;  %v865_v6 = vsel %vm114_vm2, %v862_v62, %v864_v49  ;;  %v853_v45 = vsel %vm81_vm0, 0.0, %v825_v63 }
 0x1d8   :  { %v884_v52 = vrot.slane %v2486_v56, 2  ;;  %v773_v39 = vadd.f32 %v772_v61, %v771_v15  ;;  %v733_v12 = vadd.f32 %v732_v11, %v731_v18  ;;  %v746_v16 = vrot.slane %v745_v13, 1  ;;  %873 = vrot.lane.b32.xlu1 %v865_v6, %s2107_s0 }
 0x1d9   :  { %v740_v1 = vadd.f32 %v739_v9, %v738_v58  ;;  %v840_v53 = vsel %vm826_vm14, %v726_v60, %v2449_v7  ;;  %v861_v8 = vrot.slane %v853_v45, 1  ;;  %v886_v19 = vrot.slane %v855_v35, 2 }
 0x1da   :  { %v774_v20 = vrot.slane %v773_v39, 1  ;;  %v836_v10 = vsel %vm818_vm5, %v2451_v14, %v2456_v5  ;;  %v747_v22 = vadd.f32 %v746_v16, %v745_v13  ;;  %v841_v15 = vsel %vm814_vm9, %v733_v12, %v840_v53 }
 0x1db   :  { %v837_v23 = vsel %vm820_vm6, %v2429_v32, %v836_v10  ;;  %v1968_v24 = vpack.c.bf16 %v781_v51, %v780_v0  ;;  %v863_v54 = vsel %vm114_vm2, %v861_v8, %v862_v62  ;;  %v887_v7 = vsel %vm157_vm1, %v884_v52, %v886_v19 }
 0x1dc   :  { %v775_v21 = vadd.f32 %v774_v20, %v773_v39  ;;  %v842_v25 = vsel %vm816_vm13, %v740_v1, %v841_v15  ;;  %871 = vrot.lane.b32.xlu0 %v863_v54, %s2107_s0  ;;  %895 = vrot.lane.b32.xlu1 %v887_v7, %s2108_s27  ;;  %v768_v14 = vadd.f32 %v767_v55, %v2464_v17  ;;  %v883_v26 = vrot.slane %v853_v45, 2 }
 0x1dd   :  { %v843_v5 = vsel %vm818_vm5, %v747_v22, %v842_v25  ;;  %v838_v32 = vsel %vm822_vm7, %v2443_v2, %v837_v23  ;;  %1969 = vmatprep.subr.bf16.mxu1 %v1968_v24  ;;  %vm905_vm11 = vcmask 130048   ;;  %vm910_vm12 = vcmask 261120  }
 0x1de   :  { %v844_v57 = vsel %vm820_vm6, %v754_v34, %v843_v5  ;;  %v856_v27 = vsel %vm81_vm0, %v775_v21, 0.0  ;;  %v839_v28 = vsel %vm824_vm10, %v2446_v4, %v838_v32  ;;  %1971 = vmatpush3.bf16.msra.mxu1 %v1968_v24  ;;  %v885_v17 = vsel %vm157_vm1, %v883_v26, %v884_v52 }
 0x1df   :  { %v845_v29 = vsel %vm822_vm7, %v761_v42, %v844_v57  ;;  %v854_v44 = vsel %vm81_vm0, 0.0, %v839_v28  ;;  %v869_v30 = vrot.slane %v856_v27, 1  ;;  %v891_v50 = vrot.slane %v856_v27, 2 }
 0x1e0   :  { %v846_v47 = vsel %vm824_vm10, %v768_v14, %v845_v29  ;;  %893 = vrot.lane.b32.xlu0 %v885_v17, %s2108_s27  ;;  %v866_v31 = vrot.slane %v854_v44, 1  ;;  %v888_v35 = vrot.slane %v854_v44, 2  ;;  %vm915_vm15 = vcmask 392192  }
 0x1e1   :  { %v867_v2 = vrot.slane %v846_v47, 1  ;;  %v889_v4 = vrot.slane %v846_v47, 2 }
 0x1e3   :  { %v870_v33 = vsel %vm114_vm2, %v867_v2, %v869_v30  ;;  %v868_v34 = vsel %vm114_vm2, %v866_v31, %v867_v2  ;;  %v892_v36 = vsel %vm157_vm1, %v889_v4, %v891_v50  ;;  %v890_v38 = vsel %vm157_vm1, %v888_v35, %v889_v4 }
 0x1e4   :  { %877 = vrot.lane.b32.xlu1 %v870_v33, %s2107_s0  ;;  %875 = vrot.lane.b32.xlu0 %v868_v34, %s2107_s0 }
 0x1e8   :  { %899 = vrot.lane.b32.xlu1 %v892_v36, %s2108_s27  ;;  %897 = vrot.lane.b32.xlu0 %v890_v38, %s2108_s27 }
 0x24a   :  { %v874_v40 = vpop.permute.xlu1 %873 }
 0x24b   :  { %v907_v42 = vsel %vm905_vm11, %v2486_v56, %v874_v40 }
 0x24e   :  { %v872_v3 = vpop.permute.xlu0 %871  ;;  %v896_v37 = vpop.permute.xlu1 %895 }
 0x24f   :  { %v906_v55 = vsel %vm905_vm11, %v853_v45, %v872_v3  ;;  %v912_v46 = vsel %vm910_vm12, %v907_v42, %v896_v37 }
 0x252   :  { %v894_v48 = vpop.permute.xlu0 %893 }
 0x253   :  { %v911_v18 = vsel %vm910_vm12, %v906_v55, %v894_v48 }
 0x254   :  { %1893 = vmatprep.mubr.msk.f32.mxu1 %vm915_vm15, %v911_v18 }
 0x255   :  { %1894 = vmatmul.mubr.msk.f32.vlgmr.msra.gmra.mrb[0].mxu1 %vm915_vm15, %v912_v46 }
 0x256   :  { %v878_v58 = vpop.permute.xlu1 %877  ;;  %v876_v59 = vpop.permute.xlu0 %875 }
 0x257   :  { %v909_v62 = vsel %vm905_vm11, %v846_v47, %v878_v58  ;;  %v908_v63 = vsel %vm905_vm11, %v854_v44, %v876_v59 }
 0x25a   :  { %v900_v49 = vpop.permute.xlu1 %899  ;;  %v898_v61 = vpop.permute.xlu0 %897 }
 0x25b   :  { %v914_v56 = vsel %vm910_vm12, %v909_v62, %v900_v49  ;;  %v913_v60 = vsel %vm910_vm12, %v908_v63, %v898_v61 }
 0x25c   :  { %1896 = vmatprep.mubr.msk.f32.mxu1 %vm915_vm15, %v913_v60 }
 0x25d   :  { %1897 = vmatmul.mubr.msk.f32.gmra.mrb[2].mxu1 %vm915_vm15, %v914_v56 }
 0x328   :  { %v1895_v11 = vpop.f32.mrb[0].mxu1 }
 0x329   :  { %vm1014_vm3 = vcmp.ge.f32.partialorder %v1895_v11, 0.0  ;;  %v1018_v9 = vmul.f32 0.2, %v1895_v11  ;;  %v994_v13 = vpop.f32.mrb[1].mxu1 }
 0x32a   :  { %vm1013_vm4 = vcmp.ge.f32.partialorder %v994_v13, 0.0  ;;  %v1017_v6 = vmul.f32 0.2, %v994_v13 }
 0x32b   :  { %v1022_v45 = vsel %vm1014_vm3, %v1895_v11, %v1018_v9 }
 0x32c   :  { %v1046_v52 = vcombine.high %v1022_v45, %v1022_v45  ;;  %v1053_v39 = vrot.slane %v1022_v45, %v2334_v43  ;;  %v1021_v0 = vsel %vm1013_vm4, %v994_v13, %v1017_v6 }
 0x32d   :  { %v1029_v51 = vcombine.high %v1021_v0, %v1021_v0  ;;  %v1036_v12 = vrot.slane %v1021_v0, %v2334_v43 }
 0x32e   :  { %v1060_v1 = vrot.slane %v1046_v52, %v2334_v43  ;;  %v1061_v16 = vcombine.high %v1053_v39, %v1053_v39  ;;  %v1141_v53 = vsel %vm551_vm8, %v1053_v39, 0.0 }
 0x32f   :  { %v1142_v8 = vrot.slane %v1141_v53, 4  ;;  %v1043_v19 = vrot.slane %v1029_v51, %v2334_v43  ;;  %v1044_v20 = vcombine.high %v1036_v12, %v1036_v12  ;;  %v1113_v10 = vsel %vm551_vm8, %v1036_v12, 0.0 }
 0x330   :  { %v1062_v22 = vcombine.high %v1060_v1, %v1060_v1  ;;  %v1148_v15 = vsel %vm551_vm8, %v1061_v16, 0.0  ;;  %v1155_v23 = vsel %vm551_vm8, %v1060_v1, 0.0  ;;  %v1114_v24 = vrot.slane %v1113_v10, 4  ;;  %v1898_v54 = vpop.f32.mrb[2].mxu1 }
 0x331   :  { %v1143_v7 = vadd.f32 %v1142_v8, %v1141_v53  ;;  %v1149_v21 = vrot.slane %v1148_v15, 4  ;;  %v1045_v25 = vcombine.high %v1043_v19, %v1043_v19  ;;  %v1004_v14 = vpop.f32.mrb[3].mxu1  ;;  %v1120_v26 = vsel %vm551_vm8, %v1044_v20, 0.0 }
 0x332   :  { %v1162_v5 = vsel %vm551_vm8, %v1062_v22, 0.0  ;;  %v1115_v32 = vadd.f32 %v1114_v24, %v1113_v10  ;;  %v1127_v57 = vsel %vm551_vm8, %v1043_v19, 0.0  ;;  %v1156_v28 = vrot.slane %v1155_v23, 4 }
 0x333   :  { %v1144_v27 = vrot.slane %v1143_v7, 2  ;;  %v1121_v44 = vrot.slane %v1120_v26, 4  ;;  %v1128_v17 = vrot.slane %v1127_v57, 4  ;;  %v1134_v47 = vsel %vm551_vm8, %v1045_v25, 0.0 }
 0x334   :  { %v1116_v29 = vrot.slane %v1115_v32, 2  ;;  %v1150_v2 = vadd.f32 %v1149_v21, %v1148_v15  ;;  %v1163_v30 = vrot.slane %v1162_v5, 4  ;;  %v1135_v4 = vrot.slane %v1134_v47, 4 }
 0x335   :  { %v1122_v33 = vadd.f32 %v1121_v44, %v1120_v26  ;;  %v1129_v34 = vadd.f32 %v1128_v17, %v1127_v57  ;;  %v1145_v50 = vadd.f32 %v1144_v27, %v1143_v7  ;;  %v1157_v35 = vadd.f32 %v1156_v28, %v1155_v23 }
 0x336   :  { %v1117_v31 = vadd.f32 %v1116_v29, %v1115_v32  ;;  %v1136_v40 = vadd.f32 %v1135_v4, %v1134_v47  ;;  %vm1016_vm3 = vcmp.ge.f32.partialorder %v1898_v54, 0.0  ;;  %v1151_v3 = vrot.slane %v1150_v2, 2 }
 0x337   :  { %v1123_v36 = vrot.slane %v1122_v33, 2  ;;  %v1130_v38 = vrot.slane %v1129_v34, 2  ;;  %v1164_v37 = vadd.f32 %v1163_v30, %v1162_v5  ;;  %v1020_v42 = vmul.f32 0.2, %v1898_v54 }
 0x338   :  { %v1118_v55 = vrot.slane %v1117_v31, 1  ;;  %v1137_v18 = vrot.slane %v1136_v40, 2  ;;  %v1146_v58 = vrot.slane %v1145_v50, 1  ;;  %v1158_v59 = vrot.slane %v1157_v35, 2 }
 0x339   :  { %v1124_v46 = vadd.f32 %v1123_v36, %v1122_v33  ;;  %v1131_v48 = vadd.f32 %v1130_v38, %v1129_v34  ;;  %v1024_v62 = vsel %vm1016_vm3, %v1898_v54, %v1020_v42  ;;  %vm1015_vm4 = vcmp.ge.f32.partialorder %v1004_v14, 0.0 }
 0x33a   :  { %v1138_v56 = vadd.f32 %v1137_v18, %v1136_v40  ;;  %v1080_v61 = vcombine.high %v1024_v62, %v1024_v62  ;;  %v1152_v60 = vadd.f32 %v1151_v3, %v1150_v2  ;;  %v1087_v11 = vrot.slane %v1024_v62, %v2334_v43 }
 0x33b   :  { %v1125_v49 = vrot.slane %v1124_v46, 1  ;;  %v1132_v63 = vrot.slane %v1131_v48, 1  ;;  %v1019_v9 = vmul.f32 0.2, %v1004_v14  ;;  %v1165_v13 = vrot.slane %v1164_v37, 2 }
 0x33c   :  { %v1119_v6 = vadd.f32 %v1118_v55, %v1117_v31  ;;  %v1139_v52 = vrot.slane %v1138_v56, 1  ;;  %v1094_v39 = vrot.slane %v1080_v61, %v2334_v43  ;;  %v1095_v51 = vcombine.high %v1087_v11, %v1087_v11 }
 0x33d   :  { %v1126_v45 = vadd.f32 %v1125_v49, %v1124_v46  ;;  %v1133_v0 = vadd.f32 %v1132_v63, %v1131_v48  ;;  %v1197_v12 = vsel %vm551_vm8, %v1087_v11, 0.0  ;;  %v1023_v1 = vsel %vm1015_vm4, %v1004_v14, %v1019_v9 }
 0x33e   :  { %v1159_v16 = vadd.f32 %v1158_v59, %v1157_v35  ;;  %v1096_v8 = vcombine.high %v1094_v39, %v1094_v39  ;;  %v1198_v19 = vrot.slane %v1197_v12, 4  ;;  %v1204_v20 = vsel %vm551_vm8, %v1095_v51, 0.0 }
 0x33f   :  { %v1247_v53 = vsel %vm814_vm9, %v1126_v45, %v1119_v6  ;;  %v1211_v10 = vsel %vm551_vm8, %v1094_v39, 0.0  ;;  %v1063_v22 = vcombine.high %v1023_v1, %v1023_v1  ;;  %v1166_v15 = vadd.f32 %v1165_v13, %v1164_v37  ;;  %v1226_v39 = vld [vmem:[#allocation4 + $0x8] sm:$0xff] }
 0x340   :  { %v1140_v23 = vadd.f32 %v1139_v52, %v1138_v56  ;;  %v1199_v24 = vadd.f32 %v1198_v19, %v1197_v12  ;;  %v1205_v54 = vrot.slane %v1204_v20, 4  ;;  %v1218_v7 = vsel %vm551_vm8, %v1096_v8, 0.0  ;;  %v1225_v52 = vld [vmem:[#allocation4] sm:$0xff] }
 0x341   :  { %v1153_v21 = vrot.slane %v1152_v60, 1  ;;  %v1248_v25 = vsel %vm816_vm13, %v1133_v0, %v1247_v53  ;;  %v1070_v14 = vrot.slane %v1023_v1, %v2334_v43  ;;  %v1077_v5 = vrot.slane %v1063_v22, %v2334_v43 }
 0x342   :  { %v1147_v32 = vadd.f32 %v1146_v58, %v1145_v50  ;;  %v1160_v26 = vrot.slane %v1159_v16, 1  ;;  %v1200_v57 = vrot.slane %v1199_v24, 2  ;;  %v1212_v27 = vrot.slane %v1211_v10, 4 }
 0x343   :  { %v1219_v28 = vrot.slane %v1218_v7, 4  ;;  %v1078_v29 = vcombine.high %v1070_v14, %v1070_v14  ;;  %v1079_v44 = vcombine.high %v1077_v5, %v1077_v5  ;;  %v1169_v17 = vsel %vm551_vm8, %v1070_v14, 0.0  ;;  %v1229_v14 = vld [vmem:[#allocation4 + $0x20] sm:$0xff] }
 0x344   :  { %v1206_v47 = vadd.f32 %v1205_v54, %v1204_v20  ;;  %v1170_v2 = vrot.slane %v1169_v17, 4  ;;  %v1167_v30 = vrot.slane %v1166_v15, 1  ;;  %v1249_v31 = vsel %vm818_vm5, %v1140_v23, %v1248_v25  ;;  %v1227_v20 = vld [vmem:[#allocation4 + $0x10] sm:$0xff] }
 0x345   :  { %v1154_v33 = vadd.f32 %v1153_v21, %v1152_v60  ;;  %v1176_v34 = vsel %vm551_vm8, %v1078_v29, 0.0  ;;  %v1183_v4 = vsel %vm551_vm8, %v1077_v5, 0.0  ;;  %v1190_v50 = vsel %vm551_vm8, %v1079_v44, 0.0  ;;  %v1230_v5 = vld [vmem:[#allocation4 + $0x28] sm:$0xff] }
 0x346   :  { %v1161_v35 = vadd.f32 %v1160_v26, %v1159_v16  ;;  %v2572_v36 = vadd.f32 %v1200_v57, %v1199_v24  ;;  %v1213_v38 = vadd.f32 %v1212_v27, %v1211_v10  ;;  %v1171_v40 = vadd.f32 %v1170_v2, %v1169_v17  ;;  %v1228_v10 = vld [vmem:[#allocation4 + $0x18] sm:$0xff] }
 0x347   :  { %v1177_v3 = vrot.slane %v1176_v34, 4  ;;  %v1184_v37 = vrot.slane %v1183_v4, 4  ;;  %v1191_v42 = vrot.slane %v1190_v50, 4  ;;  %v1250_v55 = vsel %vm820_vm6, %v1147_v32, %v1249_v31 }
 0x348   :  { %v1207_v46 = vrot.slane %v1206_v47, 2  ;;  %v1220_v48 = vadd.f32 %v1219_v28, %v1218_v7  ;;  %v1172_v18 = vrot.slane %v1171_v40, 2  ;;  %v1168_v58 = vadd.f32 %v1167_v30, %v1166_v15 }
 0x349   :  { %v1178_v59 = vadd.f32 %v1177_v3, %v1176_v34  ;;  %v1185_v62 = vadd.f32 %v1184_v37, %v1183_v4  ;;  %v1192_v49 = vadd.f32 %v1191_v42, %v1190_v50  ;;  %v1251_v63 = vsel %vm822_vm7, %v1154_v33, %v1250_v55 }
 0x34a   :  { %v1202_v56 = vrot.slane %v2572_v36, 1  ;;  %v1214_v61 = vrot.slane %v1213_v38, 2  ;;  %v1173_v60 = vadd.f32 %v1172_v18, %v1171_v40  ;;  %v1252_v11 = vsel %vm824_vm10, %v1161_v35, %v1251_v63 }
 0x34b   :  { %v1179_v9 = vrot.slane %v1178_v59, 2  ;;  %v1186_v13 = vrot.slane %v1185_v62, 2  ;;  %v1193_v6 = vrot.slane %v1192_v49, 2  ;;  %v2579_v45 = vsel %vm81_vm0, 0.0, %v1252_v11 }
 0x34c   :  { %v1208_v0 = vadd.f32 %v1207_v46, %v1206_v47  ;;  %v1174_v51 = vrot.slane %v1173_v60, 1  ;;  %v1265_v12 = vsel %vm81_vm0, %v1168_v58, 0.0  ;;  %v1271_v1 = vrot.slane %v2579_v45, 1 }
 0x34d   :  { %v1180_v16 = vadd.f32 %v1179_v9, %v1178_v59  ;;  %v1187_v53 = vadd.f32 %v1186_v13, %v1185_v62  ;;  %v1194_v8 = vadd.f32 %v1193_v6, %v1192_v49  ;;  %v1272_v19 = vrot.slane %v1265_v12, 1  ;;  %v1487_v6 = vld [vmem:[#allocation6] sm:$0xff] }
 0x34e   :  { %v1215_v22 = vadd.f32 %v1214_v61, %v1213_v38  ;;  %v1283_v15 = vrot.slane %v2579_v45, 2  ;;  %v1221_v23 = vrot.slane %v1220_v48, 2  ;;  %v1972_v24 = vpack.c.bf16 %v1226_v39, %v1225_v52  ;;  %v1488_v52 = vld [vmem:[#allocation6 + $0x8] sm:$0xff]  ;;  %v1489_v39 = vld [vmem:[#allocation6 + $0x10] sm:$0xff] }
 0x34f   :  { %v1181_v54 = vrot.slane %v1180_v16, 1  ;;  %v1188_v7 = vrot.slane %v1187_v53, 1  ;;  %v1195_v21 = vrot.slane %v1194_v8, 1  ;;  %v1273_v25 = vsel %vm114_vm2, %v1271_v1, %v1272_v19  ;;  %v1491_v1 = vld [vmem:[#allocation6 + $0x20] sm:$0xff]  ;;  %v1494_v19 = vld [vmem:[#allocation6 + $0x38] sm:$0xff] }
 0x350   :  { %v1209_v32 = vrot.slane %v1208_v0, 1  ;;  %v1175_v26 = vadd.f32 %v1174_v51, %v1173_v60  ;;  %1277 = vrot.lane.b32.xlu0 %v1273_v25, %s2107_s0  ;;  %v1222_v57 = vadd.f32 %v1221_v23, %v1220_v48  ;;  %1973 = vmatprep.subr.bf16.mxu0 %v1972_v24  ;;  %v1976_v27 = vpack.c.bf16 %v1228_v10, %v1227_v20  ;;  %v1490_v51 = vld [vmem:[#allocation6 + $0x18] sm:$0xff] }
 0x351   :  { %v1182_v28 = vadd.f32 %v1181_v54, %v1180_v16  ;;  %v1189_v29 = vadd.f32 %v1188_v7, %v1187_v53  ;;  %v1196_v44 = vadd.f32 %v1195_v21, %v1194_v8  ;;  %v1284_v17 = vrot.slane %v1265_v12, 2  ;;  %1975 = vmatpush3.bf16.msra.mxu0 %v1972_v24  ;;  %v1492_v16 = vld [vmem:[#allocation6 + $0x28] sm:$0xff]  ;;  %v1493_v8 = vld [vmem:[#allocation6 + $0x30] sm:$0xff] }
 0x352   :  { %v1216_v47 = vrot.slane %v1215_v22, 1  ;;  %v1223_v2 = vrot.slane %v1222_v57, 1  ;;  %1977 = vmatprep.subr.bf16.mxu0 %v1976_v27  ;;  %v1980_v30 = vpack.c.bf16 %v1230_v5, %v1229_v14  ;;  %v1203_v34 = vadd.f32 %v1202_v56, %v2572_v36 }
 0x353   :  { %v1253_v31 = vsel %vm814_vm9, %v1182_v28, %v1175_v26  ;;  %v1285_v33 = vsel %vm157_vm1, %v1283_v15, %v1284_v17  ;;  %v1210_v35 = vadd.f32 %v1209_v32, %v1208_v0  ;;  %v2109_v0 = vmov 0.0|0.0  }
 0x354   :  { %v1254_v4 = vsel %vm816_vm13, %v1189_v29, %v1253_v31  ;;  %1289 = vrot.lane.b32.xlu0 %v1285_v33, %s2108_s27  ;;  %v1224_v50 = vadd.f32 %v1223_v2, %v1222_v57  ;;  %v1217_v40 = vadd.f32 %v1216_v47, %v1215_v22  ;;  %1984 = vmatprep.subr.bf16.mxu1 %v2109_v0  ;;  %vm1430_vm8 = vcmask 254976  }
 0x355   :  { %v1255_v38 = vsel %vm818_vm5, %v1196_v44, %v1254_v4  ;;  %1979 = vmatpush3.bf16.msra.mxu0 %v1976_v27  ;;  %v1988_v12 = vpack.c.bf16 %v1490_v51, %v1489_v39  ;;  %v1991_v53 = vpack.c.bf16 %v1492_v16, %v1491_v1  ;;  %v1994_v20 = vpack.c.bf16 %v1494_v19, %v1493_v8 }
 0x356   :  { %v1256_v3 = vsel %vm820_vm6, %v1203_v34, %v1255_v38  ;;  %1981 = vmatprep.subr.bf16.mxu0 %v1980_v30  ;;  %v1266_v42 = vsel %vm81_vm0, %v1224_v50, 0.0  ;;  %vm1517_vm6 = vcmask 1044480  }
 0x357   :  { %v1257_v37 = vsel %vm822_vm7, %v1210_v35, %v1256_v3  ;;  %v1275_v48 = vrot.slane %v1266_v42, 1  ;;  %v1287_v59 = vrot.slane %v1266_v42, 2  ;;  %vm2110_vm7 = vmmov 0  }
 0x358   :  { %v1258_v55 = vsel %vm824_vm10, %v1217_v40, %v1257_v37 }
 0x359   :  { %v1264_v36 = vsel %vm81_vm0, 0.0, %v1258_v55  ;;  %1983 = vmatpush3.bf16.msra.mxu0 %v1980_v30 }
 0x35a   :  { %v1274_v46 = vrot.slane %v1264_v36, 1  ;;  %v1286_v58 = vrot.slane %v1264_v36, 2  ;;  %2002 = vmatprep.subr.bf16.mxu0 %v2109_v0 }
 0x35c   :  { %v1276_v18 = vsel %vm114_vm2, %v1274_v46, %v1275_v48  ;;  %v1288_v62 = vsel %vm157_vm1, %v1286_v58, %v1287_v59 }
 0x35d   :  { %1279 = vrot.lane.b32.xlu1 %v1276_v18, %s2107_s0 }
 0x361   :  { %1291 = vrot.lane.b32.xlu1 %v1288_v62, %s2108_s27 }
 0x3c2   :  { %v1278_v49 = vpop.permute.xlu0 %1277 }
 0x3c3   :  { %v1295_v63 = vsel %vm905_vm11, %v2579_v45, %v1278_v49  ;;  %v1985_v45 = vpack.c.bf16 %v1488_v52, %v1487_v6 }
 0x3c5   :  { %1986 = vmatpush3.bf16.msra.mxu1 %v1985_v45 }
 0x3c6   :  { %v1290_v56 = vpop.permute.xlu0 %1289  ;;  %1987 = vmatprep.subr.bf16.mxu1 %v2109_v0 }
 0x3c7   :  { %v1297_v61 = vsel %vm910_vm12, %v1295_v63, %v1290_v56 }
 0x3c8   :  { %1911 = vmatprep.mubr.msk.f32.mxu0 %vm915_vm15, %v1297_v61 }
 0x3c9   :  { %1989 = vmatpush3.bf16.msra.mxu1 %v1988_v12 }
 0x3ca   :  { %1990 = vmatprep.subr.bf16.mxu1 %v2109_v0 }
 0x3cd   :  { %1992 = vmatpush3.bf16.msra.mxu1 %v1991_v53 }
 0x3ce   :  { %1993 = vmatprep.subr.bf16.mxu1 %v2109_v0 }
 0x3cf   :  { %v1280_v60 = vpop.permute.xlu1 %1279 }
 0x3d0   :  { %v1296_v11 = vsel %vm905_vm11, %v1264_v36, %v1280_v60 }
 0x3d1   :  { %1995 = vmatpush3.bf16.msra.mxu1 %v1994_v20  ;;  %v1495_v20 = vld [vmem:[#allocation6 + $0x40] sm:$0xff] }
 0x3d2   :  { %1996 = vmatprep.subr.bf16.mxu1 %v2109_v0 }
 0x3d3   :  { %v1292_v9 = vpop.permute.xlu1 %1291 }
 0x3d4   :  { %v1298_v13 = vsel %vm910_vm12, %v1296_v11, %v1292_v9 }
 0x3d5   :  { %1912 = vmatmul.mubr.msk.f32.vlgmr.msra.gmra.mrb[8].mxu0 %vm915_vm15, %v1298_v13 }
 0x4a8   :  { %v1913_v10 = vpop.f32.mrb[8].mxu0 }
 0x4a9   :  { %vm1381_vm1 = vcmp.ge.f32.partialorder %v1913_v10, 0.0  ;;  %v1383_v22 = vmul.f32 0.2, %v1913_v10  ;;  %v1371_v15 = vpop.f32.mrb[9].mxu0 }
 0x4aa   :  { %vm1380_vm2 = vcmp.ge.f32.partialorder %v1371_v15, 0.0  ;;  %v1382_v23 = vmul.f32 0.2, %v1371_v15 }
 0x4ab   :  { %v1385_v24 = vsel %vm1381_vm1, %v1913_v10, %v1383_v22  ;;  %v1496_v10 = vld [vmem:[#allocation6 + $0x48] sm:$0xff] }
 0x4ac   :  { %v1405_v54 = vcombine.high %v1385_v24, %v1385_v24  ;;  %v1412_v7 = vrot.slane %v1385_v24, %v2334_v43  ;;  %v1384_v21 = vsel %vm1380_vm2, %v1371_v15, %v1382_v23  ;;  %v1997_v24 = vpack.c.bf16 %v1496_v10, %v1495_v20 }
 0x4ad   :  { %v1388_v25 = vcombine.high %v1384_v21, %v1384_v21  ;;  %v1395_v14 = vrot.slane %v1384_v21, %v2334_v43 }
 0x4ae   :  { %v1419_v5 = vrot.slane %v1405_v54, %v2334_v43  ;;  %v1420_v32 = vcombine.high %v1412_v7, %v1412_v7  ;;  %v1459_v26 = vsel %vm1430_vm8, %v1412_v7, 0.0  ;;  %1998 = vmatpush3.bf16.msra.mxu1 %v1997_v24 }
 0x4af   :  { %v1460_v57 = vrot.slane %v1459_v26, 4  ;;  %v1402_v27 = vrot.slane %v1388_v25, %v2334_v43  ;;  %v1403_v28 = vcombine.high %v1395_v14, %v1395_v14  ;;  %v1431_v29 = vsel %vm1430_vm8, %v1395_v14, 0.0  ;;  %1999 = vmatprep.subr.bf16.mxu1 %v2109_v0 }
 0x4b0   :  { %v1421_v44 = vcombine.high %v1419_v5, %v1419_v5  ;;  %v1466_v17 = vsel %vm1430_vm8, %v1420_v32, 0.0  ;;  %v1473_v47 = vsel %vm1430_vm8, %v1419_v5, 0.0  ;;  %v1432_v2 = vrot.slane %v1431_v29, 4 }
 0x4b1   :  { %v1461_v30 = vadd.f32 %v1460_v57, %v1459_v26  ;;  %v1467_v31 = vrot.slane %v1466_v17, 4  ;;  %v1474_v33 = vrot.slane %v1473_v47, 4  ;;  %v1404_v34 = vcombine.high %v1402_v27, %v1402_v27 }
 0x4b2   :  { %v1480_v4 = vsel %vm1430_vm8, %v1421_v44, 0.0  ;;  %v1433_v50 = vadd.f32 %v1432_v2, %v1431_v29  ;;  %v1438_v35 = vsel %vm1430_vm8, %v1403_v28, 0.0  ;;  %v1445_v38 = vsel %vm1430_vm8, %v1402_v27, 0.0  ;;  %v1497_v29 = vld [vmem:[#allocation6 + $0x50] sm:$0xff]  ;;  %v1498_v44 = vld [vmem:[#allocation6 + $0x58] sm:$0xff] }
 0x4b3   :  { %v1462_v40 = vrot.slane %v1461_v30, 2  ;;  %v1468_v3 = vadd.f32 %v1467_v31, %v1466_v17  ;;  %v1475_v37 = vadd.f32 %v1474_v33, %v1473_v47  ;;  %v1481_v42 = vrot.slane %v1480_v4, 4 }
 0x4b4   :  { %v1434_v55 = vrot.slane %v1433_v50, 2  ;;  %v1439_v36 = vrot.slane %v1438_v35, 4  ;;  %v1446_v46 = vrot.slane %v1445_v38, 4  ;;  %v1452_v48 = vsel %vm1430_vm8, %v1404_v34, 0.0 }
 0x4b5   :  { %v1463_v18 = vadd.f32 %v1462_v40, %v1461_v30  ;;  %v1469_v58 = vrot.slane %v1468_v3, 2  ;;  %v1476_v59 = vrot.slane %v1475_v37, 2  ;;  %v1482_v62 = vadd.f32 %v1481_v42, %v1480_v4 }
 0x4b6   :  { %v1435_v49 = vadd.f32 %v1434_v55, %v1433_v50  ;;  %v1440_v63 = vadd.f32 %v1439_v36, %v1438_v35  ;;  %v1447_v56 = vadd.f32 %v1446_v46, %v1445_v38  ;;  %v1453_v61 = vrot.slane %v1452_v48, 4 }
 0x4b7   :  { %v1464_v60 = vrot.slane %v1463_v18, 1  ;;  %v1470_v11 = vadd.f32 %v1469_v58, %v1468_v3  ;;  %v1477_v9 = vadd.f32 %v1476_v59, %v1475_v37  ;;  %v1483_v13 = vrot.slane %v1482_v62, 2 }
 0x4b8   :  { %v1441_v6 = vrot.slane %v1440_v63, 2  ;;  %v1448_v52 = vrot.slane %v1447_v56, 2  ;;  %v1454_v39 = vadd.f32 %v1453_v61, %v1452_v48  ;;  %v1436_v1 = vrot.slane %v1435_v49, 1 }
 0x4b9   :  { %v1471_v45 = vrot.slane %v1470_v11, 1  ;;  %v1478_v51 = vrot.slane %v1477_v9, 1  ;;  %v1484_v12 = vadd.f32 %v1483_v13, %v1482_v62  ;;  %v1465_v16 = vadd.f32 %v1464_v60, %v1463_v18  ;;  %v1675_v60 = vld [vmem:[%s2694_s5 + $0x18] sm:$0xff]  ;;  %v1677_v13 = vld [vmem:[%s2694_s5 + $0x28] sm:$0xff] }
 0x4ba   :  { %v1442_v53 = vadd.f32 %v1441_v6, %v1440_v63  ;;  %v1449_v8 = vadd.f32 %v1448_v52, %v1447_v56  ;;  %v1455_v19 = vrot.slane %v1454_v39, 2  ;;  %v1437_v25 = vadd.f32 %v1436_v1, %v1435_v49  ;;  %v1672_v49 = vld [vmem:[%s2694_s5] sm:$0xff]  ;;  %v1673_v63 = vld [vmem:[%s2694_s5 + $0x8] sm:$0xff]  ;;  %v1674_v56 = vld [vmem:[%s2694_s5 + $0x10] sm:$0xff] }
 0x4bb   :  { %v1472_v22 = vadd.f32 %v1471_v45, %v1470_v11  ;;  %v1479_v15 = vadd.f32 %v1478_v51, %v1477_v9  ;;  %v1485_v23 = vrot.slane %v1484_v12, 1  ;;  %v2000_v30 = vpack.c.bf16 %v1498_v44, %v1497_v29  ;;  %v1676_v9 = vld [vmem:[%s2694_s5 + $0x20] sm:$0xff] }
 0x4bc   :  { %v1443_v54 = vrot.slane %v1442_v53, 1  ;;  %v1450_v7 = vrot.slane %v1449_v8, 1  ;;  %v1456_v21 = vadd.f32 %v1455_v19, %v1454_v39  ;;  %v2111_v31 = vmov 0.0  }
 0x4bd   :  { %v1486_v14 = vadd.f32 %v1485_v23, %v1484_v12  ;;  %v1510_v5 = vsel %vm814_vm9, %v1472_v22, %v1465_v16  ;;  %1938 = vmatprep.mubr.msk.f32.mxu1 %vm2110_vm7, %v2111_v31  ;;  %1957 = vmatprep.mubr.msk.f32.mxu0 %vm2110_vm7, %v2111_v31  ;;  %v2003_v61 = vpack.c.bf16 %v1673_v63, %v1672_v49  ;;  %v1679_v23 = vld [vmem:[%s2694_s5 + $0x38] sm:$0xff] }
 0x4be   :  { %v1444_v32 = vadd.f32 %v1443_v54, %v1442_v53  ;;  %v1451_v26 = vadd.f32 %v1450_v7, %v1449_v8  ;;  %v1511_v57 = vsel %vm816_vm13, %v1479_v15, %v1510_v5  ;;  %v1457_v27 = vrot.slane %v1456_v21, 1  ;;  %2001 = vmatpush3.bf16.msra.mxu1 %v2000_v30 }
 0x4bf   :  { %v1512_v28 = vsel %vm818_vm5, %v1486_v14, %v1511_v57  ;;  %2004 = vmatpush3.bf16.msra.mxu0 %v2003_v61  ;;  %v2006_v11 = vpack.c.bf16 %v1675_v60, %v1674_v56  ;;  %v2009_v6 = vpack.c.bf16 %v1677_v13, %v1676_v9 }
 0x4c0   :  { %v1516_v17 = vsel %vm81_vm0, 0.0, %v1512_v28  ;;  %v1458_v47 = vadd.f32 %v1457_v27, %v1456_v21  ;;  %v1507_v2 = vsel %vm814_vm9, %v1444_v32, %v1437_v25  ;;  %vm1540_vm9 = vcmask 523264   ;;  %2005 = vmatprep.subr.bf16.mxu0 %v2109_v0 }
 0x4c1   :  { %v1519_v33 = vsel %vm1517_vm6, %v1516_v17, 0.0  ;;  %v1508_v34 = vsel %vm816_vm13, %v1451_v26, %v1507_v2 }
 0x4c2   :  { %v1523_v4 = vrot.slane %v1519_v33, 1  ;;  %v1509_v50 = vsel %vm818_vm5, %v1458_v47, %v1508_v34  ;;  %v1531_v3 = vrot.slane %v1519_v33, 2 }
 0x4c3   :  { %v1515_v35 = vsel %vm81_vm0, 0.0, %v1509_v50  ;;  %vm1546_vm0 = vcmask 785408   ;;  %2007 = vmatpush3.bf16.msra.mxu0 %v2006_v11 }
 0x4c4   :  { %1526 = vrot.lane.b32.xlu1 %v1523_v4, %s2108_s27  ;;  %v1518_v38 = vsel %vm1517_vm6, %v1515_v35, 0.0  ;;  %2008 = vmatprep.subr.bf16.mxu0 %v2109_v0 }
 0x4c5   :  { %v1522_v40 = vrot.slane %v1518_v38, 1  ;;  %v1530_v37 = vrot.slane %v1518_v38, 2 }
 0x4c7   :  { %1524 = vrot.lane.b32.xlu0 %v1522_v40, %s2108_s27  ;;  %2010 = vmatpush3.bf16.msra.mxu0 %v2009_v6 }
 0x4c8   :  { %1534 = vrot.lane.b32.xlu1 %v1531_v3, %s2112_s28  ;;  %2011 = vmatprep.subr.bf16.mxu0 %v2109_v0  ;;  %v1678_v0 = vld [vmem:[%s2694_s5 + $0x30] sm:$0xff] }
 0x4c9   :  { %v2012_v24 = vpack.c.bf16 %v1679_v23, %v1678_v0 }
 0x4cb   :  { %1532 = vrot.lane.b32.xlu0 %v1530_v37, %s2112_s28  ;;  %2013 = vmatpush3.bf16.msra.mxu0 %v2012_v24 }
 0x536   :  { %v1527_v42 = vpop.permute.xlu1 %1526 }
 0x537   :  { %v1539_v46 = vsel %vm910_vm12, %v1519_v33, %v1527_v42 }
 0x539   :  { %v1525_v55 = vpop.permute.xlu0 %1524 }
 0x53a   :  { %v1535_v36 = vpop.permute.xlu1 %1534  ;;  %v1538_v18 = vsel %vm910_vm12, %v1518_v38, %v1525_v55  ;;  %v2113_v55 = vmov 1966171168  }
 0x53b   :  { %v1542_v48 = vsel %vm1540_vm9, %v1539_v46, %v1535_v36  ;;  %v1768_v36 = vunpack.c.l.s4 %v2113_v55 }
 0x53d   :  { %v1533_v58 = vpop.permute.xlu0 %1532  ;;  %v1769_v46 = vunpack.c.0.s8 %v1768_v36 }
 0x53e   :  { %v1541_v59 = vsel %vm1540_vm9, %v1538_v18, %v1533_v58 }
 0x53f   :  { %v1545_v62 = vcombine.low %v1541_v59, %v1542_v48  ;;  %v1772_v48 = vsub.s32 %v1769_v46, %v2331_v41 }
 0x541   :  { %1939 = vmatmul.mubr.msk.f32.vlgmr.msra.gmra.mrb[4].mxu1 %vm1546_vm0, %v1545_v62 }
 0x614   :  { %v1615_v52 = vpop.f32.mrb[4].mxu1 }
 0x615   :  { %vm1619_vm13 = vcmp.ge.f32.partialorder %v1615_v52, 0.0  ;;  %v1620_v39 = vmul.f32 0.2, %v1615_v52  ;;  %v1940_v45 = vpop.f32.mrb[5].mxu1 }
 0x617   :  { %v1621_v51 = vsel %vm1619_vm13, %v1615_v52, %v1620_v39 }
 0x618   :  { %v1623_v12 = vcombine.high %v1621_v51, %v1621_v51  ;;  %v1630_v1 = vrot.slane %v1621_v51, %v2334_v43 }
 0x61a   :  { %v1637_v16 = vrot.slane %v1623_v12, %v2334_v43  ;;  %v1638_v53 = vcombine.high %v1630_v1, %v1630_v1  ;;  %v1644_v27 = vsel %vm1430_vm8, %v1630_v1, 0.0 }
 0x61b   :  { %v1645_v29 = vrot.slane %v1644_v27, 4 }
 0x61c   :  { %v1639_v8 = vcombine.high %v1637_v16, %v1637_v16  ;;  %v1651_v19 = vsel %vm1430_vm8, %v1638_v53, 0.0  ;;  %v1658_v57 = vsel %vm1430_vm8, %v1637_v16, 0.0 }
 0x61d   :  { %v1652_v20 = vrot.slane %v1651_v19, 4  ;;  %v1659_v28 = vrot.slane %v1658_v57, 4  ;;  %v1646_v17 = vadd.f32 %v1645_v29, %v1644_v27 }
 0x61e   :  { %v1665_v10 = vsel %vm1430_vm8, %v1639_v8, 0.0 }
 0x61f   :  { %v1653_v22 = vadd.f32 %v1652_v20, %v1651_v19  ;;  %v1666_v15 = vrot.slane %v1665_v10, 4  ;;  %v1660_v44 = vadd.f32 %v1659_v28, %v1658_v57  ;;  %v1647_v2 = vrot.slane %v1646_v17, 2 }
 0x621   :  { %v1654_v54 = vrot.slane %v1653_v22, 2  ;;  %v1667_v43 = vadd.f32 %v1666_v15, %v1665_v10  ;;  %v1661_v47 = vrot.slane %v1660_v44, 2  ;;  %v1648_v31 = vadd.f32 %v1647_v2, %v1646_v17 }
 0x623   :  { %v1655_v7 = vadd.f32 %v1654_v54, %v1653_v22  ;;  %v1668_v21 = vrot.slane %v1667_v43, 2  ;;  %v1662_v30 = vadd.f32 %v1661_v47, %v1660_v44  ;;  %v1649_v34 = vrot.slane %v1648_v31, 1 }
 0x625   :  { %v1656_v25 = vrot.slane %v1655_v7, 1  ;;  %v1669_v14 = vadd.f32 %v1668_v21, %v1667_v43  ;;  %v1663_v33 = vrot.slane %v1662_v30, 1  ;;  %v1650_v38 = vadd.f32 %v1649_v34, %v1648_v31 }
 0x627   :  { %v1657_v5 = vadd.f32 %v1656_v25, %v1655_v7  ;;  %v1670_v32 = vrot.slane %v1669_v14, 1  ;;  %v1664_v4 = vadd.f32 %v1663_v33, %v1662_v30 }
 0x629   :  { %1682 = vrot.lane.b32.xlu1 %v1657_v5, %s2108_s27  ;;  %v1671_v26 = vadd.f32 %v1670_v32, %v1669_v14 }
 0x62b   :  { %1684 = vrot.lane.b32.xlu0 %v1671_v26, %s2108_s27 }
 0x69b   :  { %v1683_v50 = vpop.permute.xlu1 %1682 }
 0x69c   :  { %v1688_v37 = vsel %vm910_vm12, %v1650_v38, %v1683_v50 }
 0x69d   :  { %v1685_v35 = vpop.permute.xlu0 %1684 }
 0x69e   :  { %v1689_v40 = vsel %vm910_vm12, %v1664_v4, %v1685_v35 }
 0x69f   :  { %v1692_v3 = vrot.slane %v1689_v40, 7 }
 0x6a1   :  { %v1693_v42 = vsel %vm826_vm14, %v1692_v3, %v1688_v37 }
 0x6a2   :  { %1958 = vmatmul.mubr.msk.f32.vlgmr.msra.gmra.mrb[10].mxu0 %vm1540_vm9, %v1693_v42 }
 0x775   :  { %v1762_v18 = vpop.f32.mrb[10].mxu0 }
 0x776   :  { %v1773_v58 = vrot.slane %v1762_v18, %v1772_v48  ;;  %v1959_v59 = vpop.f32.mrb[11].mxu0 }
 0x778   :  { %v1774_v62 = vcombine.high %v1773_v58, %v1773_v58  ;;  %1816 = vst.sshfl [vmem:[%s2695_s6] sm:$0x1 pattern:$0x73625140] %v1773_v58 }
 0x77a   :  { %1817 = vst.sshfl [vmem:[%s2695_s6 + $0x1] sm:$0x1 pattern:$0x73625140] %v1774_v62 }
 0x77b   :  { %1797 = vsyncpa [#allocation3], 1 }
 0x77c   :  { %1798 = vsyncpa [#allocation5], 1 }

</bundles_post_ra>
